<compile_context>
chip_gen: v7x
topology: tpu7x:2x2x1
jax: 0.10.0
libtpu: 0.0.40
codegen_flags: <defaults>
</compile_context>

<pallas_src>
import functools

import jax
import jax.numpy as jnp
from jax.experimental import pallas as pl
from jax.experimental.pallas import tpu as pltpu


TN = 1024  # weight-tile width along N (lane-dense, 8 MiB bf16 blocks at K=4096)


def _tile_cols(w, tn):
    """(K, N) -> (N//tn, K, tn) so each column block is contiguous in HBM."""
    K, N = w.shape
    nb = N // tn
    return w.reshape(K, nb, tn).transpose(1, 0, 2)


def _single_tensorcore_chip():
    """True on single-TC chips (v5e / v6e) where L2+L3 fusion has no downside.

    On megacore chips (v7x, ...) keep layer 3 separate so layer 2's N axis
    stays 'parallel' and the 32 MiB weight stream is split across both cores.
    """
    try:
        dev = jax.devices()[0]
        if dev.platform != "tpu":
            return False
        kind = dev.device_kind.lower()
    except Exception:
        return False
    return any(t in kind for t in
               ("v5e", "v5 lite", "v5litepod", "v6e", "v6 lite", "trillium"))


# ----------------------------------------------------------------------------
# Plain linear: y = relu?(x @ W + b), single pass over K, 1-D grid over N.
# ----------------------------------------------------------------------------
def _linear_kernel(x_ref, w_ref, b_ref, o_ref, *, relu):
    j = pl.program_id(0)
    # bf16 x bf16 MXU matmul with f32 accumulation.
    out = jnp.dot(x_ref[...].astype(w_ref.dtype), w_ref[...],
                  preferred_element_type=jnp.float32)
    out = out + b_ref[pl.ds(j, 1), :]          # bias row for this N tile
    if relu:
        out = jnp.maximum(out, 0.0)
    o_ref[...] = out.astype(o_ref.dtype)


def pallas_linear(x, w_tiled, b, *, relu):
    """x: (M, K) f32; w_tiled: (nb, K, tn) bf16 (pre-tiled); b: (N,) f32."""
    M, K = x.shape
    nb, K2, tn = w_tiled.shape
    assert K2 == K
    N = nb * tn
    b2d = b.reshape(nb, tn)

    w_item = jnp.dtype(w_tiled.dtype).itemsize
    vmem_bytes = (2 * (M * K * 4 + K * tn * w_item + M * tn * 4)
                  + 2 * N * 4 + (2 << 20))

    return pl.pallas_call(
        functools.partial(_linear_kernel, relu=relu),
        out_shape=jax.ShapeDtypeStruct((M, N), x.dtype),
        grid_spec=pltpu.PrefetchScalarGridSpec(
            num_scalar_prefetch=0,
            grid=(nb,),
            in_specs=[
                pl.BlockSpec((M, K), lambda j: (0, 0)),         # x: resident
                pl.BlockSpec((None, K, tn), lambda j: (j, 0, 0)),  # contiguous W block
                pl.BlockSpec((nb, tn), lambda j: (0, 0)),        # bias: loaded once
            ],
            out_specs=pl.BlockSpec((M, tn), lambda j: (0, j)),
        ),
        compiler_params=pltpu.CompilerParams(
            dimension_semantics=("parallel",),   # megacore splits the weight stream
            vmem_limit_bytes=int(vmem_bytes),
        ),
    )(x, w_tiled, b2d)


# ----------------------------------------------------------------------------
# Fused layer2 + layer3 (single-TC chips): per N-tile j of layer 2, compute
# h2_j = relu(h1 @ W2[:, j]) and immediately accumulate h2_j @ W3[j, :] into
# an (M, 128) VMEM scratch.  Finishes with + b3.  h2 never touches HBM.
# ----------------------------------------------------------------------------
def _fused_l2_l3_kernel(h1_ref, w2_ref, b2_ref, w3_ref, b3_ref, o_ref, acc_ref):
    j = pl.program_id(0)

    @pl.when(j == 0)
    def _():
        acc_ref[...] = jnp.zeros_like(acc_ref)

    h2 = jnp.dot(h1_ref[...].astype(w2_ref.dtype), w2_ref[...],
                 preferred_element_type=jnp.float32)
    h2 = jnp.maximum(h2 + b2_ref[pl.ds(j, 1), :], 0.0)
    acc_ref[...] += jnp.dot(h2.astype(w3_ref.dtype), w3_ref[...],
                            preferred_element_type=jnp.float32)
    # Output block is constant across the grid; last write wins.
    o_ref[...] = (acc_ref[...] + b3_ref[...]).astype(o_ref.dtype)


def pallas_fused_l2_l3(h1, w2_tiled, b2, w3_rows, b3_pad):
    """h1: (M, K) f32; w2_tiled: (nb, K, tn) bf16; w3_rows: (nb, tn, C) bf16."""
    M, K = h1.shape
    nb, K2, tn = w2_tiled.shape
    assert K2 == K
    nb3, tn3, C = w3_rows.shape
    assert nb3 == nb and tn3 == tn
    N2 = nb * tn
    b2_2d = b2.reshape(nb, tn)
    b3_2d = b3_pad.reshape(1, C)

    vmem_bytes = (2 * (M * K * 4 + K * tn * 2 + tn * C * 2)
                  + 2 * (N2 * 4 + C * 4 + M * C * 4) + M * C * 4 + (2 << 20))

    return pl.pallas_call(
        _fused_l2_l3_kernel,
        out_shape=jax.ShapeDtypeStruct((M, C), jnp.float32),
        grid_spec=pltpu.PrefetchScalarGridSpec(
            num_scalar_prefetch=0,
            grid=(nb,),
            in_specs=[
                pl.BlockSpec((M, K), lambda j: (0, 0)),           # h1: resident
                pl.BlockSpec((None, K, tn), lambda j: (j, 0, 0)),  # W2 column block
                pl.BlockSpec((nb, tn), lambda j: (0, 0)),          # b2: loaded once
                pl.BlockSpec((None, tn, C), lambda j: (j, 0, 0)),  # W3 row block
                pl.BlockSpec((1, C), lambda j: (0, 0)),            # b3: loaded once
            ],
            out_specs=pl.BlockSpec((M, C), lambda j: (0, 0)),
            scratch_shapes=[pltpu.VMEM((M, C), jnp.float32)],
        ),
        compiler_params=pltpu.CompilerParams(
            dimension_semantics=("arbitrary",),   # accumulation over the N2 axis
            vmem_limit_bytes=int(vmem_bytes),
        ),
    )(h1, w2_tiled, b2_2d, w3_rows, b3_2d)


# ----------------------------------------------------------------------------
# Model
# ----------------------------------------------------------------------------
class Stage1Pallas:
    """JAX/Pallas equivalent of the PyTorch Stage1 classifier head."""

    IN_FEATURES = 256 * 2 * 2  # 1024
    HIDDEN = 4096
    NUM_CLASSES = 10
    PADDED_CLASSES = 128       # lane-dense padding for the final layer

    def __init__(self, key):
        k1, k2, k3, k4, k5, k6 = jax.random.split(key, 6)

        # Deterministic init (PyTorch-style uniform fan-in bound), f32 masters.
        def init(kw, kb, fan_in, fan_out):
            bound = 1.0 / (fan_in ** 0.5)
            w = jax.random.uniform(kw, (fan_in, fan_out), jnp.float32, -bound, bound)
            b = jax.random.uniform(kb, (fan_out,), jnp.float32, -bound, bound)
            return w, b

        self.w1, self.b1 = init(k1, k2, self.IN_FEATURES, self.HIDDEN)
        self.w2, self.b2 = init(k3, k4, self.HIDDEN, self.HIDDEN)
        self.w3, self.b3 = init(k5, k6, self.HIDDEN, self.NUM_CLASSES)

        # Zero-pad the final layer so the Pallas output is a lane-dense
        # 128-wide block (single grid step, unmasked stores).
        self.w3_pad = (jnp.zeros((self.HIDDEN, self.PADDED_CLASSES), jnp.float32)
                       .at[:, :self.NUM_CLASSES].set(self.w3))
        self.b3_pad = (jnp.zeros((self.PADDED_CLASSES,), jnp.float32)
                       .at[:self.NUM_CLASSES].set(self.b3))

        # bf16 streaming copies, pre-tiled so each grid step's weight block is
        # one contiguous slab in HBM.
        self.w1_t = _tile_cols(self.w1.astype(jnp.bfloat16), TN)           # (1024//? ,) -> (4,1024,1024)
        self.w2_t = _tile_cols(self.w2.astype(jnp.bfloat16), TN)           # (4, 4096, 1024)
        self.w3p_t = _tile_cols(self.w3_pad.astype(jnp.bfloat16),
                                self.PADDED_CLASSES)                       # (1, 4096, 128)
        # Row-tiled W3 for the fused layer-2/3 kernel (rows match W2's N tiles).
        self.w3p_rows = (self.w3_pad.astype(jnp.bfloat16)
                         .reshape(self.HIDDEN // TN, TN, self.PADDED_CLASSES))

        self._fuse_l2_l3 = _single_tensorcore_chip()

    def __call__(self, x):
        # Dropout -> identity (inference)
        h1 = pallas_linear(x, self.w1_t, self.b1, relu=True)
        # Dropout -> identity (inference)
        if self._fuse_l2_l3:
            # v5e / v6e: fuse layer 2 + layer 3 (accumulate logits under the
            # layer-2 weight stream, no h2 HBM round trip).
            out_pad = pallas_fused_l2_l3(h1, self.w2_t, self.b2,
                                         self.w3p_rows, self.b3_pad)
        else:
            # v7x (megacore): keep layer 2 'parallel', layer 3 separate.
            h2 = pallas_linear(h1, self.w2_t, self.b2, relu=True)
            out_pad = pallas_linear(h2, self.w3p_t, self.b3_pad, relu=False)
        return out_pad[:, :self.NUM_CLASSES]


if __name__ == "__main__":
    key = jax.random.PRNGKey(0)
    k_param, k_x = jax.random.split(key)

    model = Stage1Pallas(k_param)

    B = 8  # small batch (multiple of 8 sublanes)
    x = jax.random.normal(k_x, (B, Stage1Pallas.IN_FEATURES), jnp.float32)

    y = jax.block_until_ready(model(x))

    # Plain-JAX reference using the same bf16-weight / f32-accumulate math.
    def ref_lin(h, w, b, relu):
        out = jnp.dot(h.astype(jnp.bfloat16), w.astype(jnp.bfloat16),
                      preferred_element_type=jnp.float32) + b
        return jnp.maximum(out, 0.0) if relu else out

    r = ref_lin(x, model.w1, model.b1, True)
    r = ref_lin(r, model.w2, model.b2, True)
    ref = ref_lin(r, model.w3_pad, model.b3_pad, False)[:, :Stage1Pallas.NUM_CLASSES]

    assert y.shape == (B, Stage1Pallas.NUM_CLASSES)
    assert jnp.allclose(y, ref, atol=1e-2, rtol=1e-2), (
        "model path mismatch", float(jnp.max(jnp.abs(y - ref))))

    # Exercise BOTH layer-2/3 structures regardless of which one __call__ picks.
    h1 = pallas_linear(x, model.w1_t, model.b1, relu=True)
    y_fused = pallas_fused_l2_l3(h1, model.w2_t, model.b2, model.w3p_rows,
                                 model.b3_pad)[:, :Stage1Pallas.NUM_CLASSES]
    h2 = pallas_linear(h1, model.w2_t, model.b2, relu=True)
    y_split = pallas_linear(h2, model.w3p_t, model.b3_pad,
                            relu=False)[:, :Stage1Pallas.NUM_CLASSES]
    jax.block_until_ready((y_fused, y_split))
    assert jnp.allclose(y_fused, ref, atol=1e-2, rtol=1e-2), (
        "fused path mismatch", float(jnp.max(jnp.abs(y_fused - ref))))
    assert jnp.allclose(y_split, ref, atol=1e-2, rtol=1e-2), (
        "split path mismatch", float(jnp.max(jnp.abs(y_split - ref))))

    print("KERNEL_OK")
</pallas_src>

<mosaic_0001>
module attributes {stable_mosaic.version = 11 : i64} {
  func.func @_linear_kernel(%arg0: i32, %arg1: memref<8x1024xf32, #tpu.memory_space<vmem>>, %arg2: memref<1x1024x1024xbf16, #tpu.memory_space<vmem>>, %arg3: memref<4x1024xf32, #tpu.memory_space<vmem>>, %arg4: memref<8x1024xf32, #tpu.memory_space<vmem>>) attributes {dimension_semantics = [#tpu.dimension_semantics<parallel>], iteration_bounds = array<i64: 4>, scalar_prefetch = 0 : i64, scratch_operands = 0 : i64, tpu.core_type = #tpu.core_type<tc>, window_params = [{pipeline_mode = #tpu.pipeline_mode<synchronous>, transform_indices = @transform_0, window_bounds = array<i64: 8, 1024>}, {transform_indices = @transform_1, window_bounds = array<i64: 1, 1024, 1024>}, {pipeline_mode = #tpu.pipeline_mode<synchronous>, transform_indices = @transform_2, window_bounds = array<i64: 4, 1024>}, {transform_indices = @transform_3, window_bounds = array<i64: 8, 1024>}]} {
    %c0 = arith.constant 0 : index
    %c0_0 = arith.constant 0 : index
    %0 = vector.load %arg1[%c0, %c0_0] : memref<8x1024xf32, #tpu.memory_space<vmem>>, vector<8x1024xf32>
    %1 = arith.truncf %0 : vector<8x1024xf32> to vector<8x1024xbf16>
    %c0_1 = arith.constant 0 : index
    %c0_2 = arith.constant 0 : index
    %c0_3 = arith.constant 0 : index
    %2 = vector.load %arg2[%c0_1, %c0_2, %c0_3] : memref<1x1024x1024xbf16, #tpu.memory_space<vmem>>, vector<1x1024x1024xbf16>
    %3 = vector.shape_cast %2 : vector<1x1024x1024xbf16> to vector<1024x1024xbf16>
    %cst = arith.constant dense<0.000000e+00> : vector<8x1024xf32>
    %4 = tpu.matmul %1, %3, %cst {dimension_numbers = #tpu.dot_dimension_numbers<[1], [0], [0], [1], [0, 0, 1, 1], [], []>} : vector<8x1024xbf16>, vector<1024x1024xbf16>, vector<8x1024xf32> -> vector<8x1024xf32>
    %5 = arith.index_cast %arg0 : i32 to index
    %c0_4 = arith.constant 0 : index
    %6 = vector.load %arg3[%5, %c0_4] : memref<4x1024xf32, #tpu.memory_space<vmem>>, vector<1x1024xf32>
    %7 = vector.broadcast %6 : vector<1x1024xf32> to vector<8x1024xf32>
    %8 = arith.addf %4, %7 : vector<8x1024xf32>
    %cst_5 = arith.constant 0.000000e+00 : f32
    %9 = vector.broadcast %cst_5 : f32 to vector<8x1024xf32>
    %10 = arith.maximumf %8, %9 : vector<8x1024xf32>
    %c0_6 = arith.constant 0 : index
    %c0_7 = arith.constant 0 : index
    %11 = vector.load %arg4[%c0_6, %c0_7] : memref<8x1024xf32, #tpu.memory_space<vmem>>, vector<8x1024xf32>
    tpu.vector_store %arg4[%c0_6, %c0_7], %10 {strides = array<i32>} : memref<8x1024xf32, #tpu.memory_space<vmem>>, vector<8x1024xf32>,
    return
  }
  func.func @transform_0(%arg0: i32) -> (i32, i32) {
    %c0_i32 = arith.constant 0 : i32
    %c0_i32_0 = arith.constant 0 : i32
    %c0_i32_1 = arith.constant 0 : i32
    return %c0_i32, %c0_i32_0 : i32, i32
  }
  func.func @transform_1(%arg0: i32) -> (i32, i32, i32) {
    %c0_i32 = arith.constant 0 : i32
    %c0_i32_0 = arith.constant 0 : i32
    %c0_i32_1 = arith.constant 0 : i32
    return %arg0, %c0_i32, %c0_i32_0 : i32, i32, i32
  }
  func.func @transform_2(%arg0: i32) -> (i32, i32) {
    %c0_i32 = arith.constant 0 : i32
    %c0_i32_0 = arith.constant 0 : i32
    %c0_i32_1 = arith.constant 0 : i32
    return %c0_i32, %c0_i32_0 : i32, i32
  }
  func.func @transform_3(%arg0: i32) -> (i32, i32) {
    %c0_i32 = arith.constant 0 : i32
    %c0_i32_0 = arith.constant 0 : i32
    return %c0_i32, %arg0 : i32, i32
  }
}

</mosaic_0001>

<bundles_post_ra>
// kernel: tpu_custom_call.1
= control target key start
LH: loop header
LB: loop body
LE: loop exit
PB: predicated region body
PF: predicated region fallthrough
CT: control target
= control target key end

     0   :  { %8 = vsyncpa [#allocation3], 0  ;;  %s5812_s0 = inlined_call_operand.hbm [shape: f32[8,1024], index: 0, kind: input, shape index: {}]   ;;  %s5813_s1 = inlined_call_operand.hbm [shape: bf16[4,1024,1024], index: 1, kind: input, shape index: {}]   ;;  %s5814_s2 = inlined_call_operand.hbm [shape: f32[4,1024], index: 2, kind: input, shape index: {}]   ;;  %s5815_s3 = inlined_call_operand.hbm [shape: f32[8,4096], index: 3, kind: output, shape index: {}]  }
   0x1   :  { %9 = vsyncpa [#allocation6], 0 }
   0x2   :  { %11 = vsyncpa [#allocation6 + $0x1], 0 }
   0x3   :  { %12 = vsyncpa [#allocation4], 0 }
   0x4   :  { %14 = vsyncpa [#allocation4 + $0x1], 0  ;;  %s4982_s12 = smov 0   ;;  %s4984_s13 = smov 0  }
   0x5   :  { %s4986_s14 = smov 0   ;;  %s4988_s15 = smov 0  }
   0x6 LB: > { %s5003_s16 = sadd.s32 4294967295, %s4954_s15   ;;  %s4134_s17 = sadd.s32 4294967294, %s4954_s15   ;;  %s4954_s15 = sphi %s4988_s15, %s5840_s15   ;;  %s4950_s14 = sphi %s4986_s14, %s5839_s14   ;;  %s4946_s13 = sphi %s4984_s13, %s5838_s13   ;;  %s4942_s12 = sphi %s4982_s12, %s5837_s12  }
   0x7   : > { %s5007_s18 = sadd.s32 1, %s4954_s15   ;;  %s48_s19 = sadd.s32 1, %s4950_s14 }
   0x8   : > { %s45_s20 = ssub.s32 %s4954_s15, %s5007_s18  ;;  %p55_p0 = scmp.ne.s32.totalorder %s4950_s14, %s4946_s13 }
   0x9   : > { %p46_p1 = scmp.eq.s32.totalorder %s45_s20, 0  ;;  %p56_p2 = scmp.eq.s32.totalorder %s4954_s15, 0 }
   0xa   : > { %p61_p3 = scmp.ne.s32.totalorder %s4946_s13, %s4942_s12  ;;  %p5816_p4 = scmp.eq.s32.totalorder %s5003_s16, 0 }
   0xb   : > { %s5019_s21 = scalar_select %p46_p1, %s4950_s14, %s48_s19  }
   0xc   : > { %p5021_p5 = por %p56_p2, %p55_p0  ;;  %p5027_p6 = por %p5816_p4, %p61_p3 }
   0xd   : > { %p106_p7 = scmp.eq.s32.totalorder %s5003_s16, 3  ;;  %p112_p8 = scmp.eq.s32.totalorder %s4134_s17, 3 }
   0xe   : > { %s5822_s23 = scalar_select %p5027_p6, 1, 0 }
   0xf   : > { %p4135_p9 = scmp.ge.s32.totalorder %s4954_s15, 1  ;;  %p119_p10 = scmp.lt.s32.totalorder %s4954_s15, 5 }
  0x10   : > { %p5034_p11 = por %p106_p7, %p55_p0  ;;  %p5038_p12 = por %p112_p8, %p61_p3 }
  0x11   : > { %p5042_p13 = pnand %p4135_p9, %p119_p10  ;;  %s4956_s27 = smov [#allocation7]  }
  0x12   : > { %s5823_s24 = scalar_select %p5034_p11, 1, 0 }
  0x13   : > { %s5824_s25 = scalar_select %p5038_p12, 1, 0 }
  0x14   : > { %s5825_s26 = scalar_select %p5042_p13, 1, 0 }
  0x15   : > { %p4737_p1 = pneg %p5042_p13  ;;  %s143_s28 = sshll.u32 %s4956_s27, 4  ;;  %s144_s28 = int_to_ptr.vmem [resolvable:$true] %s143_s28 }
  0x16   : > { %p4754_p2 = scmp.lt.s32.totalorder %s4954_s15, 4  ;;  %s4957_s4 = smov [#allocation2]  }
  0x17   : > { %p5051_p0 = pnand %p4737_p1, %p5816_p4  ;;  %s132_s5 = sshll.u32 %s4957_s4, 4  ;;  %s5061_s5 = int_to_ptr.vmem [resolvable:$true] %s132_s5 }
  0x18   : > { %p5057_p3 = pnand %p4754_p2, %p5021_p5  ;;  %s4794_s8 = scalar_lea.hbm %s5814_s2, 512 }
  0x19   : > { %p4795_p7 = scmp.ne.s32.totalorder %s5814_s2, %s4794_s8  ;;  %p4796_p8 = pneg %p5051_p0 }
  0x1a   : > { %s5827_s30 = scalar_select %p5057_p3, 1, 0 }
  0x1b   : > { %p4797_p5 = pnand %p4796_p8, %p4795_p7  ;;  %p4801_p10 = scmp.lt.u32.totalorder %s4794_s8, %s5814_s2 }
  0x1d   : > { %p4798_p9 = pneg %p4797_p5 }
  0x1f   : > { %p4803_p1 = pnand %p4801_p10, %p4798_p9 }
  0x21   : > { %4806 = shalt.err (!%p4803_p1)
}
  0x22   : > { %s4807_s19 = scalar_lea.vmem %s144_s28, 512  ;;  %p4815_p11 = scmp.lt.s32.totalorder %s144_s28, %s144_s28 }
  0x23   : > { %p4808_p2 = scmp.ne.s32.totalorder %s144_s28, %s4807_s19  ;;  %p4816_p6 = scmp.lt.s32.totalorder %s4807_s19, %s4807_s19 }
  0x25   : > { %p4810_p4 = pnand %p4808_p2, %p4796_p8  ;;  %p4817_p13 = por %p4816_p6, %p4815_p11 }
  0x27   : > { %p4811_p12 = pneg %p4810_p4 }
  0x29   : > { %p4818_p3 = pnand %p4817_p13, %p4811_p12 }
  0x2b   : > { %4821 = shalt.err (!%p4818_p3)
}
  0x2c   : > { %4743 = dma.hbm_to_vmem [thread:$0]  (!%p5051_p0), %s5814_s2, 512, %s144_s28, [#allocation6]  }
  0x2d   : > { %s154_s27 = sand.u32 1, %s4954_s15   ;;  %s4822_s7 = scalar_lea.hbm %s5812_s0, 1024 }
  0x2e   : > { %p4823_p4 = scmp.ne.s32.totalorder %s5812_s0, %s4822_s7  ;;  %p4829_p12 = scmp.lt.u32.totalorder %s4822_s7, %s5812_s0 }
  0x30   : > { %p4825_p6 = pnand %p4823_p4, %p4796_p8 }
  0x32   : > { %p4826_p11 = pneg %p4825_p6 }
  0x34   : > { %p4831_p13 = pnand %p4829_p12, %p4826_p11 }
  0x36   : > { %4834 = shalt.err (!%p4831_p13)
}
  0x37   : > { %s4835_s28 = scalar_lea.vmem %s5061_s5, 1024  ;;  %p4843_p9 = scmp.lt.s32.totalorder %s5061_s5, %s5061_s5 }
  0x38   : > { %p4836_p3 = scmp.ne.s32.totalorder %s5061_s5, %s4835_s28  ;;  %p4844_p10 = scmp.lt.s32.totalorder %s4835_s28, %s4835_s28 }
  0x3a   : > { %p4838_p7 = pnand %p4836_p3, %p4796_p8  ;;  %p4845_p1 = por %p4844_p10, %p4843_p9 }
  0x3c   : > { %p4839_p5 = pneg %p4838_p7 }
  0x3e   : > { %p4846_p2 = pnand %p4845_p1, %p4839_p5 }
  0x40   : > { %4849 = shalt.err (!%p4846_p2)
}
  0x41   : > { %4740 = dma.hbm_to_vmem [thread:$0]  (!%p5051_p0), %s5812_s0, 1024, %s5061_s5, [#allocation3]  }
  0x42   : > { %s156_s20 = sand.u32 1, %s4950_s14   ;;  %s4666_s4 = sshll.u32 %s4954_s15, 16 }
  0x43   : > { %s4139_s22 = sshll.u32 %s156_s20, 12  ;;  %s5116_s8 = scalar_lea.hbm %s5813_s1, %s4666_s4 }
  0x44   : > { %s158_s29 = scalar_lea.vmem [#allocation5], %s4139_s22  ;;  %s5120_s10 = scalar_lea.sflag [#allocation6], %s154_s27 }
  0x45   : > { %s165_s9 = sshll.u32 %s158_s29, 4  ;;  %s4850_s11 = scalar_lea.hbm %s5116_s8, 65536  ;;  %s5118_s9 = int_to_ptr.vmem [resolvable:$true] %s165_s9 }
  0x46   : > { %p4851_p0 = scmp.ne.s32.totalorder %s5116_s8, %s4850_s11  ;;  %p5828_p8 = scmp.ne.s32.totalorder %s5827_s30, 0 }
  0x47   : > { %s4855_s17 = scalar_lea.hbm %s5813_s1, 262144  ;;  %p4856_p12 = scmp.lt.u32.totalorder %s5116_s8, %s5813_s1 }
  0x48   : > { %p4852_p4 = pneg %p5828_p8  ;;  %p4857_p13 = scmp.lt.u32.totalorder %s4855_s17, %s4850_s11 }
  0x49   : > { %p4859_p7 = scmp.lt.u32.totalorder %s4850_s11, %s5116_s8 }
  0x4a   : > { %p4853_p6 = pnand %p4852_p4, %p4851_p0  ;;  %p4858_p3 = por %p4857_p13, %p4856_p12 }
  0x4c   : > { %p4854_p11 = pneg %p4853_p6  ;;  %p4860_p5 = por %p4859_p7, %p4858_p3 }
  0x4e   : > { %p4861_p9 = pnand %p4860_p5, %p4854_p11 }
  0x50   : > { %4864 = shalt.err (!%p4861_p9)
}
  0x51   : > { %s4865_s27 = scalar_lea.vmem %s5118_s9, 65536  ;;  %s4958_s22 = smov [#allocation5]  }
  0x52   : > { %p4866_p10 = scmp.ne.s32.totalorder %s5118_s9, %s4865_s27  ;;  %s4870_s4 = sshll.u32 %s4958_s22, 4  ;;  %s4871_s4 = int_to_ptr.vmem [resolvable:$false] %s4870_s4 }
  0x53   : > { %s4872_s6 = scalar_lea.vmem %s4871_s4, 131072  ;;  %p4873_p0 = scmp.lt.s32.totalorder %s5118_s9, %s4871_s4 }
  0x54   : > { %p4868_p1 = pnand %p4866_p10, %p4852_p4  ;;  %p4874_p6 = scmp.lt.s32.totalorder %s4872_s6, %s4865_s27 }
  0x56   : > { %p4869_p2 = pneg %p4868_p1  ;;  %p4875_p12 = por %p4874_p6, %p4873_p0 }
  0x58   : > { %p4876_p13 = pnand %p4875_p12, %p4869_p2 }
  0x5a   : > { %4879 = shalt.err (!%p4876_p13)
}
  0x5b   : > { %s4959_s7 = smov 512   ;;  %s4960_s29 = smov 32  }
  0x5c   : > { %4747 = dma.hbm_to_vmem [thread:$0]  (!%p5828_p8), %s5116_s8, 65536, %s5118_s9, %s5120_s10, %s4959_s7, %s4959_s7, %s4960_s29  }
  0x5d   : > { %p5829_p4 = scmp.ne.s32.totalorder %s5825_s26, 0 }
  0x5e   : > { %p5830_p11 = scmp.eq.s32.totalorder (!%p5829_p4), %s5003_s16, 0 }
  0x5f   : > { %177 = sbr.rel (%p5829_p4) target bundleno = 858 (0x35a), region = 32 }
  0x66   : > { %4925 = dma.done.wait (%p5830_p11), [#allocation3], 1024   ;;  %p5831_p3 = pmov %p5830_p11 }
  0x67   : > { %s183_s11 = sand.u32 1, %s5003_s16   ;;  %s5156_s5 = sand.u32 1, %s4946_s13  }
  0x68   : > { %4927 = vsyncadd (%p5831_p3), [#allocation3], 4294966272  ;;  %s4144_s28 = sshll.u32 %s5156_s5, 12  ;;  %s184_s17 = scalar_lea.sflag [#allocation6], %s183_s11 }
  0x69   : > { %s5159_s30 = scalar_lea.vmem [#allocation5], %s4144_s28  ;;  %p5832_p8 = scmp.ne.s32.totalorder %s5822_s23, 0 }
  0x6b   : > { %4929 = dma.done.wait (%p5832_p8), %s184_s17, 65536  }
  0x6c   : > { %4931 = vsyncadd (%p5832_p8), %s184_s17, 4294901760  ;;  %p5833_p7 = pmov %p5831_p3 }
  0x6d   : > { %p5834_p5 = pmov %p5831_p3 }
  0x6e   : > { %4933 = dma.done.wait (%p5833_p7), [#allocation6], 512  }
  0x6f   : > { %4935 = vsyncadd (%p5834_p5), [#allocation6], 4294966784  ;;  %v231_v0 = vld [vmem:[%s5159_s30] sm:$0xff]  ;;  %v232_v2 = vld [vmem:[%s5159_s30 + $0x8] sm:$0xff]  ;;  %s743_s23 = sshra.s32 %s5003_s16, 2  ;;  %s746_s26 = sand.u32 3, %s5003_s16 }
  0x70   : > { %v235_v1 = vld [vmem:[%s5159_s30 + $0x20] sm:$0xff]  ;;  %v236_v4 = vld [vmem:[%s5159_s30 + $0x28] sm:$0xff]  ;;  %s4667_s8 = sshll.u32 %s743_s23, 5  ;;  %s4146_s19 = sshll.u32 %s5156_s5, 6 }
  0x71   : > { %v4150_v3 = vcombine.high %v231_v0, %v235_v1  ;;  %v4149_v5 = vcombine.low %v231_v0, %v235_v1  ;;  %v239_v6 = vld [vmem:[%s5159_s30 + $0x40] sm:$0xff]  ;;  %v4152_v8 = vcombine.high %v232_v2, %v236_v4  ;;  %v4151_v9 = vcombine.low %v232_v2, %v236_v4  ;;  %v240_v11 = vld [vmem:[%s5159_s30 + $0x48] sm:$0xff]  ;;  %s749_s9 = sadd.s32 %s4667_s8, %s746_s26  ;;  %s5714_s20 = scalar_lea.vmem [#allocation8], %s4146_s19 }
  0x72   : > { %v243_v7 = vld [vmem:[%s5159_s30 + $0x60] sm:$0xff]  ;;  %v244_v12 = vld [vmem:[%s5159_s30 + $0x68] sm:$0xff]  ;;  %s750_s10 = scalar_lea.vmem [#allocation7], %s749_s9  ;;  %s4668_s27 = sshll.u32 %s5003_s16, 10 }
  0x73   : > { %v4158_v10 = vcombine.high %v239_v6, %v243_v7  ;;  %v247_v13 = vld [vmem:[%s5159_s30 + $0x80] sm:$0xff]  ;;  %3353 = vmatprep.subr.bf16.mxu0 %v4150_v3  ;;  %v4160_v14 = vcombine.high %v240_v11, %v244_v12  ;;  %v248_v16 = vld [vmem:[%s5159_s30 + $0x88] sm:$0xff]  ;;  %3517 = vmatprep.subr.bf16.mxu1 %v4152_v8  ;;  %v4157_v18 = vcombine.low %v239_v6, %v243_v7  ;;  %s4040_s22 = sshll.u32 %s5714_s20, 4  ;;  %s5766_s7 = scalar_lea.hbm %s5815_s3, %s4668_s27  ;;  %s5768_s22 = int_to_ptr.vmem [resolvable:$true] %s4040_s22 }
  0x74   : > { %v251_v15 = vld [vmem:[%s5159_s30 + $0xa0] sm:$0xff]  ;;  %v252_v17 = vld [vmem:[%s5159_s30 + $0xa8] sm:$0xff]  ;;  %3354 = vmatpush1.bf16.msra.mxu0 %v4149_v5  ;;  %3518 = vmatpush1.bf16.msra.mxu1 %v4151_v9  ;;  %v4159_v19 = vcombine.low %v240_v11, %v244_v12  ;;  %s4026_s16 = scalar_lea.sflag [#allocation4], %s5156_s5  ;;  %s4880_s29 = scalar_lea.vmem %s5768_s22, 1024 }
  0x75   : > { %3355 = vmatprep.subr.bf16.mxu0 %v4158_v10  ;;  %v4166_v20 = vcombine.high %v247_v13, %v251_v15  ;;  %3519 = vmatprep.subr.bf16.mxu1 %v4160_v14  ;;  %v4168_v21 = vcombine.high %v248_v16, %v252_v17  ;;  %v255_v22 = vld [vmem:[%s5159_s30 + $0xc0] sm:$0xff]  ;;  %v256_v24 = vld [vmem:[%s5159_s30 + $0xc8] sm:$0xff]  ;;  %v4165_v26 = vcombine.low %v247_v13, %v251_v15  ;;  %p4881_p9 = scmp.ne.s32.totalorder %s5768_s22, %s4880_s29  ;;  %p5835_p10 = scmp.ne.s32.totalorder %s5823_s24, 0 }
  0x76   : > { %v259_v23 = vld [vmem:[%s5159_s30 + $0xe0] sm:$0xff]  ;;  %v260_v25 = vld [vmem:[%s5159_s30 + $0xe8] sm:$0xff]  ;;  %v4167_v27 = vcombine.low %v248_v16, %v252_v17  ;;  %s4961_s11 = smov [#allocation8]  }
  0x77   : > { %v4174_v28 = vcombine.high %v255_v22, %v259_v23  ;;  %v4176_v29 = vcombine.high %v256_v24, %v260_v25  ;;  %v263_v30 = vld [vmem:[%s5159_s30 + $0x100] sm:$0xff]  ;;  %v264_v32 = vld [vmem:[%s5159_s30 + $0x108] sm:$0xff]  ;;  %v4173_v34 = vcombine.low %v255_v22, %v259_v23  ;;  %v4175_v35 = vcombine.low %v256_v24, %v260_v25  ;;  %p4882_p1 = pnand %p4881_p9, %p5835_p10  ;;  %s4884_s28 = sshll.u32 %s4961_s11, 4  ;;  %s4885_s28 = int_to_ptr.vmem [resolvable:$false] %s4884_s28 }
  0x78   : > { %3356 = vmatpush1.bf16.msra.mxu0 %v4157_v18  ;;  %3520 = vmatpush1.bf16.msra.mxu1 %v4159_v19  ;;  %v267_v31 = vld [vmem:[%s5159_s30 + $0x120] sm:$0xff]  ;;  %v268_v33 = vld [vmem:[%s5159_s30 + $0x128] sm:$0xff]  ;;  %s4886_s17 = scalar_lea.vmem %s4885_s28, 2048  ;;  %p4887_p0 = scmp.lt.s32.totalorder %s5768_s22, %s4885_s28 }
  0x79   : > { %3357 = vmatprep.subr.bf16.mxu0 %v4166_v20  ;;  %3521 = vmatprep.subr.bf16.mxu1 %v4168_v21  ;;  %v4182_v36 = vcombine.high %v263_v30, %v267_v31  ;;  %v4184_v37 = vcombine.high %v264_v32, %v268_v33  ;;  %v271_v38 = vld [vmem:[%s5159_s30 + $0x140] sm:$0xff]  ;;  %v272_v40 = vld [vmem:[%s5159_s30 + $0x148] sm:$0xff]  ;;  %v4181_v42 = vcombine.low %v263_v30, %v267_v31  ;;  %p4883_p2 = pneg %p4882_p1  ;;  %p4888_p6 = scmp.lt.s32.totalorder %s4886_s17, %s4880_s29 }
  0x7a   : > { %v275_v39 = vld [vmem:[%s5159_s30 + $0x160] sm:$0xff]  ;;  %v276_v41 = vld [vmem:[%s5159_s30 + $0x168] sm:$0xff]  ;;  %v4183_v43 = vcombine.low %v264_v32, %v268_v33 }
  0x7b   : > { %v4190_v44 = vcombine.high %v271_v38, %v275_v39  ;;  %v4192_v45 = vcombine.high %v272_v40, %v276_v41  ;;  %v279_v46 = vld [vmem:[%s5159_s30 + $0x180] sm:$0xff]  ;;  %v280_v48 = vld [vmem:[%s5159_s30 + $0x188] sm:$0xff]  ;;  %v4189_v50 = vcombine.low %v271_v38, %v275_v39  ;;  %v4191_v51 = vcombine.low %v272_v40, %v276_v41  ;;  %p4889_p12 = por %p4888_p6, %p4887_p0 }
  0x7c   : > { %3358 = vmatpush1.bf16.msra.mxu0 %v4165_v26  ;;  %3522 = vmatpush1.bf16.msra.mxu1 %v4167_v27  ;;  %v283_v47 = vld [vmem:[%s5159_s30 + $0x1a0] sm:$0xff]  ;;  %v284_v49 = vld [vmem:[%s5159_s30 + $0x1a8] sm:$0xff] }
  0x7d   : > { %3359 = vmatprep.subr.bf16.mxu0 %v4174_v28  ;;  %3523 = vmatprep.subr.bf16.mxu1 %v4176_v29  ;;  %v4198_v52 = vcombine.high %v279_v46, %v283_v47  ;;  %v216_v53 = vld [vmem:[#allocation2 + $0x8] sm:$0xff]  ;;  %v4200_v54 = vcombine.high %v280_v48, %v284_v49  ;;  %v287_v55 = vld [vmem:[%s5159_s30 + $0x1c0] sm:$0xff]  ;;  %v4197_v60 = vcombine.low %v279_v46, %v283_v47  ;;  %p4890_p13 = pnand %p4889_p12, %p4883_p2 }
  0x7e   : > { %v291_v56 = vld [vmem:[%s5159_s30 + $0x1e0] sm:$0xff]  ;;  %v5199_v57 = vpack.c.bf16 %v216_v53, %v216_v53  ;;  %v288_v58 = vld [vmem:[%s5159_s30 + $0x1c8] sm:$0xff]  ;;  %v4199_v61 = vcombine.low %v280_v48, %v284_v49 }
  0x7f   : > { %v292_v59 = vld [vmem:[%s5159_s30 + $0x1e8] sm:$0xff]  ;;  %v4206_v62 = vcombine.high %v287_v55, %v291_v56  ;;  %v295_v0 = vld [vmem:[%s5159_s30 + $0x200] sm:$0xff]  ;;  %v4205_v4 = vcombine.low %v287_v55, %v291_v56 }
  0x80   : > { %3360 = vmatpush1.bf16.msra.mxu0 %v4173_v34  ;;  %3524 = vmatpush1.bf16.msra.mxu1 %v4175_v35  ;;  %v4208_v63 = vcombine.high %v288_v58, %v292_v59  ;;  %v299_v1 = vld [vmem:[%s5159_s30 + $0x220] sm:$0xff]  ;;  %v296_v2 = vld [vmem:[%s5159_s30 + $0x208] sm:$0xff]  ;;  %v4207_v5 = vcombine.low %v288_v58, %v292_v59 }
  0x81   : > { %3361 = vmatprep.subr.bf16.mxu0 %v4182_v36  ;;  %3525 = vmatprep.subr.bf16.mxu1 %v4184_v37  ;;  %v300_v3 = vld [vmem:[%s5159_s30 + $0x228] sm:$0xff]  ;;  %v4214_v6 = vcombine.high %v295_v0, %v299_v1  ;;  %v303_v8 = vld [vmem:[%s5159_s30 + $0x240] sm:$0xff]  ;;  %v4213_v12 = vcombine.low %v295_v0, %v299_v1 }
  0x82   : > { %3385 = vmatprep.mubr.bf16.mxu0 %v5199_v57  ;;  %3549 = vmatprep.mubr.bf16.mxu1 %v5199_v57  ;;  %v4216_v7 = vcombine.high %v296_v2, %v300_v3  ;;  %v307_v9 = vld [vmem:[%s5159_s30 + $0x260] sm:$0xff]  ;;  %v304_v10 = vld [vmem:[%s5159_s30 + $0x248] sm:$0xff]  ;;  %v4215_v13 = vcombine.low %v296_v2, %v300_v3 }
  0x83   : > { %v308_v11 = vld [vmem:[%s5159_s30 + $0x268] sm:$0xff]  ;;  %v4222_v14 = vcombine.high %v303_v8, %v307_v9  ;;  %v311_v16 = vld [vmem:[%s5159_s30 + $0x280] sm:$0xff]  ;;  %v4221_v20 = vcombine.low %v303_v8, %v307_v9 }
  0x84   : > { %3362 = vmatpush1.bf16.msra.mxu0 %v4181_v42  ;;  %3526 = vmatpush1.bf16.msra.mxu1 %v4183_v43  ;;  %v4224_v15 = vcombine.high %v304_v10, %v308_v11  ;;  %v315_v17 = vld [vmem:[%s5159_s30 + $0x2a0] sm:$0xff]  ;;  %v312_v18 = vld [vmem:[%s5159_s30 + $0x288] sm:$0xff]  ;;  %v4223_v21 = vcombine.low %v304_v10, %v308_v11 }
  0x85   : > { %3363 = vmatprep.subr.bf16.mxu0 %v4190_v44  ;;  %3527 = vmatprep.subr.bf16.mxu1 %v4192_v45  ;;  %v316_v19 = vld [vmem:[%s5159_s30 + $0x2a8] sm:$0xff]  ;;  %v4230_v22 = vcombine.high %v311_v16, %v315_v17  ;;  %v319_v24 = vld [vmem:[%s5159_s30 + $0x2c0] sm:$0xff]  ;;  %v4229_v28 = vcombine.low %v311_v16, %v315_v17 }
  0x86   : > { %v4232_v23 = vcombine.high %v312_v18, %v316_v19  ;;  %v323_v25 = vld [vmem:[%s5159_s30 + $0x2e0] sm:$0xff]  ;;  %v320_v26 = vld [vmem:[%s5159_s30 + $0x2c8] sm:$0xff]  ;;  %v4231_v29 = vcombine.low %v312_v18, %v316_v19 }
  0x87   : > { %v324_v27 = vld [vmem:[%s5159_s30 + $0x2e8] sm:$0xff]  ;;  %v4238_v30 = vcombine.high %v319_v24, %v323_v25  ;;  %v327_v32 = vld [vmem:[%s5159_s30 + $0x300] sm:$0xff]  ;;  %v4237_v36 = vcombine.low %v319_v24, %v323_v25 }
  0x88   : > { %3364 = vmatpush1.bf16.msra.mxu0 %v4189_v50  ;;  %3528 = vmatpush1.bf16.msra.mxu1 %v4191_v51  ;;  %v4240_v31 = vcombine.high %v320_v26, %v324_v27  ;;  %v331_v33 = vld [vmem:[%s5159_s30 + $0x320] sm:$0xff]  ;;  %v328_v34 = vld [vmem:[%s5159_s30 + $0x308] sm:$0xff]  ;;  %v4239_v37 = vcombine.low %v320_v26, %v324_v27 }
  0x89   : > { %3365 = vmatprep.subr.bf16.mxu0 %v4198_v52  ;;  %3529 = vmatprep.subr.bf16.mxu1 %v4200_v54  ;;  %v332_v35 = vld [vmem:[%s5159_s30 + $0x328] sm:$0xff]  ;;  %v4246_v38 = vcombine.high %v327_v32, %v331_v33  ;;  %v335_v40 = vld [vmem:[%s5159_s30 + $0x340] sm:$0xff]  ;;  %v4245_v44 = vcombine.low %v327_v32, %v331_v33 }
  0x8a   : > { %v4248_v39 = vcombine.high %v328_v34, %v332_v35  ;;  %v339_v41 = vld [vmem:[%s5159_s30 + $0x360] sm:$0xff]  ;;  %v336_v42 = vld [vmem:[%s5159_s30 + $0x348] sm:$0xff]  ;;  %v4247_v45 = vcombine.low %v328_v34, %v332_v35 }
  0x8b   : > { %v340_v43 = vld [vmem:[%s5159_s30 + $0x368] sm:$0xff]  ;;  %v4254_v46 = vcombine.high %v335_v40, %v339_v41  ;;  %v343_v48 = vld [vmem:[%s5159_s30 + $0x380] sm:$0xff]  ;;  %v4253_v52 = vcombine.low %v335_v40, %v339_v41 }
  0x8c   : > { %3366 = vmatpush1.bf16.msra.mxu0 %v4197_v60  ;;  %3530 = vmatpush1.bf16.msra.mxu1 %v4199_v61  ;;  %v4256_v47 = vcombine.high %v336_v42, %v340_v43  ;;  %v347_v49 = vld [vmem:[%s5159_s30 + $0x3a0] sm:$0xff]  ;;  %v344_v50 = vld [vmem:[%s5159_s30 + $0x388] sm:$0xff]  ;;  %v4255_v53 = vcombine.low %v336_v42, %v340_v43 }
  0x8d   : > { %3367 = vmatprep.subr.bf16.mxu0 %v4206_v62  ;;  %3531 = vmatprep.subr.bf16.mxu1 %v4208_v63  ;;  %v348_v51 = vld [vmem:[%s5159_s30 + $0x3a8] sm:$0xff]  ;;  %v4262_v54 = vcombine.high %v343_v48, %v347_v49  ;;  %v351_v56 = vld [vmem:[%s5159_s30 + $0x3c0] sm:$0xff]  ;;  %v4261_v61 = vcombine.low %v343_v48, %v347_v49 }
  0x8e   : > { %v4264_v55 = vcombine.high %v344_v50, %v348_v51  ;;  %v355_v58 = vld [vmem:[%s5159_s30 + $0x3e0] sm:$0xff]  ;;  %v352_v59 = vld [vmem:[%s5159_s30 + $0x3c8] sm:$0xff]  ;;  %v4263_v62 = vcombine.low %v344_v50, %v348_v51 }
  0x8f   : > { %v356_v60 = vld [vmem:[%s5159_s30 + $0x3e8] sm:$0xff]  ;;  %v4270_v63 = vcombine.high %v351_v56, %v355_v58  ;;  %v359_v1 = vld [vmem:[%s5159_s30 + $0x400] sm:$0xff] }
  0x90   : > { %3368 = vmatpush1.bf16.msra.mxu0 %v4205_v4  ;;  %3532 = vmatpush1.bf16.msra.mxu1 %v4207_v5  ;;  %v4272_v0 = vcombine.high %v352_v59, %v356_v60  ;;  %v363_v2 = vld [vmem:[%s5159_s30 + $0x420] sm:$0xff]  ;;  %v360_v3 = vld [vmem:[%s5159_s30 + $0x408] sm:$0xff]  ;;  %v4269_v5 = vcombine.low %v351_v56, %v355_v58 }
  0x91   : > { %3369 = vmatprep.subr.bf16.mxu0 %v4214_v6  ;;  %3533 = vmatprep.subr.bf16.mxu1 %v4216_v7  ;;  %v364_v4 = vld [vmem:[%s5159_s30 + $0x428] sm:$0xff]  ;;  %v215_v6 = vld [vmem:[#allocation2] sm:$0xff]  ;;  %v4271_v7 = vcombine.low %v352_v59, %v356_v60  ;;  %v4278_v8 = vcombine.high %v359_v1, %v363_v2  ;;  %v4277_v16 = vcombine.low %v359_v1, %v363_v2 }
  0x92   : > { %v4280_v9 = vcombine.high %v360_v3, %v364_v4  ;;  %v367_v10 = vld [vmem:[%s5159_s30 + $0x440] sm:$0xff]  ;;  %v4279_v17 = vcombine.low %v360_v3, %v364_v4  ;;  %v380_v24 = vld [vmem:[%s5159_s30 + $0x4a8] sm:$0xff] }
  0x93   : > { %v371_v11 = vld [vmem:[%s5159_s30 + $0x460] sm:$0xff]  ;;  %v388_v32 = vld [vmem:[%s5159_s30 + $0x4e8] sm:$0xff] }
  0x94   : > { %3370 = vmatpush1.bf16.msra.mxu0 %v4213_v12  ;;  %3534 = vmatpush1.bf16.msra.mxu1 %v4215_v13  ;;  %v5243_v12 = vpack.c.bf16 %v215_v6, %v215_v6  ;;  %v368_v13 = vld [vmem:[%s5159_s30 + $0x448] sm:$0xff]  ;;  %v4286_v18 = vcombine.high %v367_v10, %v371_v11  ;;  %v4285_v25 = vcombine.low %v367_v10, %v371_v11  ;;  %v423_v6 = vld [vmem:[%s5159_s30 + $0x600] sm:$0xff] }
  0x95   : > { %3371 = vmatprep.subr.bf16.mxu0 %v4222_v14  ;;  %3535 = vmatprep.subr.bf16.mxu1 %v4224_v15  ;;  %v372_v14 = vld [vmem:[%s5159_s30 + $0x468] sm:$0xff]  ;;  %v218_v15 = vld [vmem:[#allocation2 + $0x18] sm:$0xff] }
  0x96   : > { %v4288_v19 = vcombine.high %v368_v13, %v372_v14  ;;  %v4287_v26 = vcombine.low %v368_v13, %v372_v14  ;;  %v396_v40 = vld [vmem:[%s5159_s30 + $0x528] sm:$0xff] }
  0x97   : > { %v404_v48 = vld [vmem:[%s5159_s30 + $0x568] sm:$0xff] }
  0x98   : > { %3372 = vmatpush1.bf16.msra.mxu0 %v4221_v20  ;;  %3536 = vmatpush1.bf16.msra.mxu1 %v4223_v21  ;;  %v375_v20 = vld [vmem:[%s5159_s30 + $0x480] sm:$0xff]  ;;  %v412_v56 = vld [vmem:[%s5159_s30 + $0x5a8] sm:$0xff] }
  0x99   : > { %3373 = vmatprep.subr.bf16.mxu0 %v4230_v22  ;;  %3537 = vmatprep.subr.bf16.mxu1 %v4232_v23  ;;  %v379_v21 = vld [vmem:[%s5159_s30 + $0x4a0] sm:$0xff]  ;;  %v5249_v22 = vpack.c.bf16 %v218_v15, %v218_v15  ;;  %v376_v23 = vld [vmem:[%s5159_s30 + $0x488] sm:$0xff] }
  0x9a   : > { %v4294_v27 = vcombine.high %v375_v20, %v379_v21  ;;  %v4293_v33 = vcombine.low %v375_v20, %v379_v21  ;;  %v4295_v34 = vcombine.low %v376_v23, %v380_v24  ;;  %v420_v1 = vld [vmem:[%s5159_s30 + $0x5e8] sm:$0xff]  ;;  %v431_v15 = vld [vmem:[%s5159_s30 + $0x640] sm:$0xff] }
  0x9c   : > { %3374 = vmatpush1.bf16.msra.mxu0 %v4229_v28  ;;  %3538 = vmatpush1.bf16.msra.mxu1 %v4231_v29  ;;  %v4296_v28 = vcombine.high %v376_v23, %v380_v24  ;;  %v383_v29 = vld [vmem:[%s5159_s30 + $0x4c0] sm:$0xff] }
  0x9d   : > { %3375 = vmatprep.subr.bf16.mxu0 %v4238_v30  ;;  %3539 = vmatprep.subr.bf16.mxu1 %v4240_v31  ;;  %v387_v30 = vld [vmem:[%s5159_s30 + $0x4e0] sm:$0xff]  ;;  %v384_v31 = vld [vmem:[%s5159_s30 + $0x4c8] sm:$0xff] }
  0x9e   : > { %v4302_v35 = vcombine.high %v383_v29, %v387_v30  ;;  %v4301_v41 = vcombine.low %v383_v29, %v387_v30  ;;  %v4303_v42 = vcombine.low %v384_v31, %v388_v32  ;;  %v439_v24 = vld [vmem:[%s5159_s30 + $0x680] sm:$0xff] }
  0xa0   : > { %3376 = vmatpush1.bf16.msra.mxu0 %v4237_v36  ;;  %3540 = vmatpush1.bf16.msra.mxu1 %v4239_v37  ;;  %v4304_v36 = vcombine.high %v384_v31, %v388_v32  ;;  %v391_v37 = vld [vmem:[%s5159_s30 + $0x500] sm:$0xff] }
  0xa1   : > { %3377 = vmatprep.subr.bf16.mxu0 %v4246_v38  ;;  %3541 = vmatprep.subr.bf16.mxu1 %v4248_v39  ;;  %v395_v38 = vld [vmem:[%s5159_s30 + $0x520] sm:$0xff]  ;;  %v392_v39 = vld [vmem:[%s5159_s30 + $0x508] sm:$0xff] }
  0xa2   : > { %v4310_v43 = vcombine.high %v391_v37, %v395_v38  ;;  %v4309_v49 = vcombine.low %v391_v37, %v395_v38  ;;  %v4311_v50 = vcombine.low %v392_v39, %v396_v40  ;;  %v447_v32 = vld [vmem:[%s5159_s30 + $0x6c0] sm:$0xff] }
  0xa4   : > { %3378 = vmatpush1.bf16.msra.mxu0 %v4245_v44  ;;  %3542 = vmatpush1.bf16.msra.mxu1 %v4247_v45  ;;  %v4312_v44 = vcombine.high %v392_v39, %v396_v40  ;;  %v399_v45 = vld [vmem:[%s5159_s30 + $0x540] sm:$0xff] }
  0xa5   : > { %3379 = vmatprep.subr.bf16.mxu0 %v4254_v46  ;;  %3543 = vmatprep.subr.bf16.mxu1 %v4256_v47  ;;  %v403_v46 = vld [vmem:[%s5159_s30 + $0x560] sm:$0xff]  ;;  %v400_v47 = vld [vmem:[%s5159_s30 + $0x548] sm:$0xff] }
  0xa6   : > { %v4318_v51 = vcombine.high %v399_v45, %v403_v46  ;;  %v4317_v58 = vcombine.low %v399_v45, %v403_v46  ;;  %v4319_v59 = vcombine.low %v400_v47, %v404_v48  ;;  %v455_v40 = vld [vmem:[%s5159_s30 + $0x700] sm:$0xff] }
  0xa8   : > { %3380 = vmatpush1.bf16.msra.mxu0 %v4253_v52  ;;  %3544 = vmatpush1.bf16.msra.mxu1 %v4255_v53  ;;  %v4320_v52 = vcombine.high %v400_v47, %v404_v48  ;;  %v407_v53 = vld [vmem:[%s5159_s30 + $0x580] sm:$0xff] }
  0xa9   : > { %3381 = vmatprep.subr.bf16.mxu0 %v4262_v54  ;;  %3545 = vmatprep.subr.bf16.mxu1 %v4264_v55  ;;  %v411_v54 = vld [vmem:[%s5159_s30 + $0x5a0] sm:$0xff]  ;;  %v408_v55 = vld [vmem:[%s5159_s30 + $0x588] sm:$0xff] }
  0xaa   : > { %v4326_v60 = vcombine.high %v407_v53, %v411_v54  ;;  %v4325_v2 = vcombine.low %v407_v53, %v411_v54  ;;  %v4327_v3 = vcombine.low %v408_v55, %v412_v56  ;;  %v463_v48 = vld [vmem:[%s5159_s30 + $0x740] sm:$0xff] }
  0xac   : > { %3382 = vmatpush1.bf16.msra.mxu0 %v4261_v61  ;;  %3546 = vmatpush1.bf16.msra.mxu1 %v4263_v62  ;;  %v4328_v61 = vcombine.high %v408_v55, %v412_v56  ;;  %v415_v62 = vld [vmem:[%s5159_s30 + $0x5c0] sm:$0xff] }
  0xad   : > { %3383 = vmatprep.subr.bf16.mxu0 %v4270_v63  ;;  %3547 = vmatprep.subr.bf16.mxu1 %v4272_v0  ;;  %v419_v63 = vld [vmem:[%s5159_s30 + $0x5e0] sm:$0xff]  ;;  %v416_v0 = vld [vmem:[%s5159_s30 + $0x5c8] sm:$0xff] }
  0xae   : > { %v4334_v4 = vcombine.high %v415_v62, %v419_v63  ;;  %v4333_v10 = vcombine.low %v415_v62, %v419_v63  ;;  %v4335_v11 = vcombine.low %v416_v0, %v420_v1  ;;  %v471_v56 = vld [vmem:[%s5159_s30 + $0x780] sm:$0xff] }
  0xb0   : > { %3384 = vmatpush1.bf16.msra.mxu0 %v4269_v5  ;;  %3548 = vmatpush1.bf16.msra.mxu1 %v4271_v7  ;;  %v4336_v5 = vcombine.high %v416_v0, %v420_v1  ;;  %v427_v7 = vld [vmem:[%s5159_s30 + $0x620] sm:$0xff] }
  0xb1   : > { %3394 = vmatprep.subr.bf16.mxu0 %v4278_v8  ;;  %3558 = vmatprep.subr.bf16.mxu1 %v4280_v9  ;;  %v424_v8 = vld [vmem:[%s5159_s30 + $0x608] sm:$0xff]  ;;  %v4342_v13 = vcombine.high %v423_v6, %v427_v7  ;;  %v479_v1 = vld [vmem:[%s5159_s30 + $0x7c0] sm:$0xff] }
  0xb2   : > { %v428_v9 = vld [vmem:[%s5159_s30 + $0x628] sm:$0xff] }
  0xb3   : > { %3386 = vmatmul.mubr.bf16.vlgmr.msra.gmra.mrb[0].mxu0 %v5243_v12  ;;  %3550 = vmatmul.mubr.bf16.vlgmr.msra.gmra.mrb[0].mxu1 %v5243_v12  ;;  %v4344_v14 = vcombine.high %v424_v8, %v428_v9  ;;  %v4343_v20 = vcombine.low %v424_v8, %v428_v9  ;;  %v487_v9 = vld [vmem:[%s5159_s30 + $0x800] sm:$0xff] }
  0xb4   : > { %3395 = vmatpush1.bf16.msra.mxu0 %v4277_v16  ;;  %3559 = vmatpush1.bf16.msra.mxu1 %v4279_v17  ;;  %v435_v16 = vld [vmem:[%s5159_s30 + $0x660] sm:$0xff]  ;;  %v432_v17 = vld [vmem:[%s5159_s30 + $0x648] sm:$0xff] }
  0xb5   : > { %3396 = vmatprep.subr.bf16.mxu0 %v4286_v18  ;;  %3560 = vmatprep.subr.bf16.mxu1 %v4288_v19  ;;  %v436_v18 = vld [vmem:[%s5159_s30 + $0x668] sm:$0xff]  ;;  %v4341_v19 = vcombine.low %v423_v6, %v427_v7  ;;  %v4350_v21 = vcombine.high %v431_v15, %v435_v16 }
  0xb6   : > { %3426 = vmatprep.mubr.bf16.mxu0 %v5249_v22  ;;  %3590 = vmatprep.mubr.bf16.mxu1 %v5249_v22  ;;  %v4352_v23 = vcombine.high %v432_v17, %v436_v18  ;;  %v4351_v29 = vcombine.low %v432_v17, %v436_v18 }
  0xb8   : > { %3397 = vmatpush1.bf16.msra.mxu0 %v4285_v25  ;;  %3561 = vmatpush1.bf16.msra.mxu1 %v4287_v26  ;;  %v443_v25 = vld [vmem:[%s5159_s30 + $0x6a0] sm:$0xff]  ;;  %v440_v26 = vld [vmem:[%s5159_s30 + $0x688] sm:$0xff] }
  0xb9   : > { %3398 = vmatprep.subr.bf16.mxu0 %v4294_v27  ;;  %3562 = vmatprep.subr.bf16.mxu1 %v4296_v28  ;;  %v444_v27 = vld [vmem:[%s5159_s30 + $0x6a8] sm:$0xff]  ;;  %v4349_v28 = vcombine.low %v431_v15, %v435_v16  ;;  %v4358_v30 = vcombine.high %v439_v24, %v443_v25  ;;  %v217_v15 = vld [vmem:[#allocation2 + $0x10] sm:$0xff] }
  0xba   : > { %v4360_v31 = vcombine.high %v440_v26, %v444_v27  ;;  %v4359_v37 = vcombine.low %v440_v26, %v444_v27 }
  0xbc   : > { %3399 = vmatpush1.bf16.msra.mxu0 %v4293_v33  ;;  %3563 = vmatpush1.bf16.msra.mxu1 %v4295_v34  ;;  %v451_v33 = vld [vmem:[%s5159_s30 + $0x6e0] sm:$0xff]  ;;  %v448_v34 = vld [vmem:[%s5159_s30 + $0x6c8] sm:$0xff] }
  0xbd   : > { %3400 = vmatprep.subr.bf16.mxu0 %v4302_v35  ;;  %3564 = vmatprep.subr.bf16.mxu1 %v4304_v36  ;;  %v452_v35 = vld [vmem:[%s5159_s30 + $0x6e8] sm:$0xff]  ;;  %v4357_v36 = vcombine.low %v439_v24, %v443_v25  ;;  %v4366_v38 = vcombine.high %v447_v32, %v451_v33 }
  0xbe   : > { %v4368_v39 = vcombine.high %v448_v34, %v452_v35  ;;  %v4367_v45 = vcombine.low %v448_v34, %v452_v35  ;;  %v500_v24 = vld [vmem:[%s5159_s30 + $0x868] sm:$0xff] }
  0xbf   : > { %v220_v25 = vld [vmem:[#allocation2 + $0x28] sm:$0xff] }
  0xc0   : > { %3401 = vmatpush1.bf16.msra.mxu0 %v4301_v41  ;;  %3565 = vmatpush1.bf16.msra.mxu1 %v4303_v42  ;;  %v459_v41 = vld [vmem:[%s5159_s30 + $0x720] sm:$0xff]  ;;  %v456_v42 = vld [vmem:[%s5159_s30 + $0x708] sm:$0xff] }
  0xc1   : > { %3402 = vmatprep.subr.bf16.mxu0 %v4310_v43  ;;  %3566 = vmatprep.subr.bf16.mxu1 %v4312_v44  ;;  %v460_v43 = vld [vmem:[%s5159_s30 + $0x728] sm:$0xff]  ;;  %v4365_v44 = vcombine.low %v447_v32, %v451_v33  ;;  %v4374_v46 = vcombine.high %v455_v40, %v459_v41  ;;  %v5321_v32 = vpack.c.bf16 %v220_v25, %v220_v25 }
  0xc2   : > { %v4376_v47 = vcombine.high %v456_v42, %v460_v43  ;;  %v4375_v53 = vcombine.low %v456_v42, %v460_v43  ;;  %v504_v33 = vld [vmem:[%s5159_s30 + $0x888] sm:$0xff] }
  0xc3   : > { %v508_v34 = vld [vmem:[%s5159_s30 + $0x8a8] sm:$0xff] }
  0xc4   : > { %3403 = vmatpush1.bf16.msra.mxu0 %v4309_v49  ;;  %3567 = vmatpush1.bf16.msra.mxu1 %v4311_v50  ;;  %v467_v49 = vld [vmem:[%s5159_s30 + $0x760] sm:$0xff]  ;;  %v464_v50 = vld [vmem:[%s5159_s30 + $0x748] sm:$0xff] }
  0xc5   : > { %3404 = vmatprep.subr.bf16.mxu0 %v4318_v51  ;;  %3568 = vmatprep.subr.bf16.mxu1 %v4320_v52  ;;  %v468_v51 = vld [vmem:[%s5159_s30 + $0x768] sm:$0xff]  ;;  %v4373_v52 = vcombine.low %v455_v40, %v459_v41  ;;  %v4382_v54 = vcombine.high %v463_v48, %v467_v49  ;;  %v515_v40 = vld [vmem:[%s5159_s30 + $0x8e0] sm:$0xff] }
  0xc6   : > { %v4384_v55 = vcombine.high %v464_v50, %v468_v51  ;;  %v4383_v62 = vcombine.low %v464_v50, %v468_v51  ;;  %v512_v41 = vld [vmem:[%s5159_s30 + $0x8c8] sm:$0xff] }
  0xc7   : > { %v516_v42 = vld [vmem:[%s5159_s30 + $0x8e8] sm:$0xff] }
  0xc8   : > { %3405 = vmatpush1.bf16.msra.mxu0 %v4317_v58  ;;  %3569 = vmatpush1.bf16.msra.mxu1 %v4319_v59  ;;  %v475_v58 = vld [vmem:[%s5159_s30 + $0x7a0] sm:$0xff]  ;;  %v472_v59 = vld [vmem:[%s5159_s30 + $0x788] sm:$0xff] }
  0xc9   : > { %3406 = vmatprep.subr.bf16.mxu0 %v4326_v60  ;;  %3570 = vmatprep.subr.bf16.mxu1 %v4328_v61  ;;  %v476_v60 = vld [vmem:[%s5159_s30 + $0x7a8] sm:$0xff]  ;;  %v4381_v61 = vcombine.low %v463_v48, %v467_v49  ;;  %v4390_v63 = vcombine.high %v471_v56, %v475_v58  ;;  %v523_v48 = vld [vmem:[%s5159_s30 + $0x920] sm:$0xff] }
  0xca   : > { %v4392_v0 = vcombine.high %v472_v59, %v476_v60  ;;  %v4391_v6 = vcombine.low %v472_v59, %v476_v60  ;;  %v520_v49 = vld [vmem:[%s5159_s30 + $0x908] sm:$0xff] }
  0xcb   : > { %v524_v50 = vld [vmem:[%s5159_s30 + $0x928] sm:$0xff] }
  0xcc   : > { %3407 = vmatpush1.bf16.msra.mxu0 %v4325_v2  ;;  %3571 = vmatpush1.bf16.msra.mxu1 %v4327_v3  ;;  %v483_v2 = vld [vmem:[%s5159_s30 + $0x7e0] sm:$0xff]  ;;  %v480_v3 = vld [vmem:[%s5159_s30 + $0x7c8] sm:$0xff] }
  0xcd   : > { %3408 = vmatprep.subr.bf16.mxu0 %v4334_v4  ;;  %3572 = vmatprep.subr.bf16.mxu1 %v4336_v5  ;;  %v484_v4 = vld [vmem:[%s5159_s30 + $0x7e8] sm:$0xff]  ;;  %v4389_v5 = vcombine.low %v471_v56, %v475_v58  ;;  %v4398_v7 = vcombine.high %v479_v1, %v483_v2  ;;  %v531_v56 = vld [vmem:[%s5159_s30 + $0x960] sm:$0xff] }
  0xce   : > { %v4400_v8 = vcombine.high %v480_v3, %v484_v4  ;;  %v4399_v16 = vcombine.low %v480_v3, %v484_v4  ;;  %v528_v58 = vld [vmem:[%s5159_s30 + $0x948] sm:$0xff] }
  0xcf   : > { %v532_v59 = vld [vmem:[%s5159_s30 + $0x968] sm:$0xff] }
  0xd0   : > { %3409 = vmatpush1.bf16.msra.mxu0 %v4333_v10  ;;  %3573 = vmatpush1.bf16.msra.mxu1 %v4335_v11  ;;  %v491_v10 = vld [vmem:[%s5159_s30 + $0x820] sm:$0xff]  ;;  %v488_v11 = vld [vmem:[%s5159_s30 + $0x808] sm:$0xff] }
  0xd1   : > { %3410 = vmatprep.subr.bf16.mxu0 %v4342_v13  ;;  %3574 = vmatprep.subr.bf16.mxu1 %v4344_v14  ;;  %v492_v13 = vld [vmem:[%s5159_s30 + $0x828] sm:$0xff]  ;;  %v4397_v14 = vcombine.low %v479_v1, %v483_v2  ;;  %v4406_v17 = vcombine.high %v487_v9, %v491_v10  ;;  %v4405_v26 = vcombine.low %v487_v9, %v491_v10  ;;  %v539_v1 = vld [vmem:[%s5159_s30 + $0x9a0] sm:$0xff] }
  0xd2   : > { %v4408_v18 = vcombine.high %v488_v11, %v492_v13  ;;  %v4407_v27 = vcombine.low %v488_v11, %v492_v13  ;;  %v536_v2 = vld [vmem:[%s5159_s30 + $0x988] sm:$0xff]  ;;  %v547_v9 = vld [vmem:[%s5159_s30 + $0x9e0] sm:$0xff] }
  0xd3   : > { %v540_v3 = vld [vmem:[%s5159_s30 + $0x9a8] sm:$0xff] }
  0xd4   : > { %3411 = vmatpush1.bf16.msra.mxu0 %v4341_v19  ;;  %3575 = vmatpush1.bf16.msra.mxu1 %v4343_v20  ;;  %v495_v19 = vld [vmem:[%s5159_s30 + $0x840] sm:$0xff]  ;;  %v544_v10 = vld [vmem:[%s5159_s30 + $0x9c8] sm:$0xff] }
  0xd5   : > { %3412 = vmatprep.subr.bf16.mxu0 %v4350_v21  ;;  %3576 = vmatprep.subr.bf16.mxu1 %v4352_v23  ;;  %v499_v20 = vld [vmem:[%s5159_s30 + $0x860] sm:$0xff]  ;;  %v5315_v21 = vpack.c.bf16 %v217_v15, %v217_v15  ;;  %v496_v23 = vld [vmem:[%s5159_s30 + $0x848] sm:$0xff] }
  0xd6   : > { %v4413_v35 = vcombine.low %v495_v19, %v499_v20  ;;  %v548_v11 = vld [vmem:[%s5159_s30 + $0x9e8] sm:$0xff] }
  0xd8   : > { %3413 = vmatpush1.bf16.msra.mxu0 %v4349_v28  ;;  %3577 = vmatpush1.bf16.msra.mxu1 %v4351_v29  ;;  %v4414_v28 = vcombine.high %v495_v19, %v499_v20  ;;  %v4416_v29 = vcombine.high %v496_v23, %v500_v24  ;;  %v552_v19 = vld [vmem:[%s5159_s30 + $0xa08] sm:$0xff] }
  0xd9   : > { %3414 = vmatprep.subr.bf16.mxu0 %v4358_v30  ;;  %3578 = vmatprep.subr.bf16.mxu1 %v4360_v31  ;;  %v503_v30 = vld [vmem:[%s5159_s30 + $0x880] sm:$0xff]  ;;  %v556_v20 = vld [vmem:[%s5159_s30 + $0xa28] sm:$0xff] }
  0xda   : > { %v507_v31 = vld [vmem:[%s5159_s30 + $0x8a0] sm:$0xff] }
  0xdb   : > { %v4421_v43 = vcombine.low %v503_v30, %v507_v31 }
  0xdc   : > { %3415 = vmatpush1.bf16.msra.mxu0 %v4357_v36  ;;  %3579 = vmatpush1.bf16.msra.mxu1 %v4359_v37  ;;  %v4415_v36 = vcombine.low %v496_v23, %v500_v24  ;;  %v4422_v37 = vcombine.high %v503_v30, %v507_v31  ;;  %v4463_v24 = vcombine.low %v544_v10, %v548_v11  ;;  %v564_v30 = vld [vmem:[%s5159_s30 + $0xa68] sm:$0xff] }
  0xdd   : > { %3416 = vmatprep.subr.bf16.mxu0 %v4366_v38  ;;  %3580 = vmatprep.subr.bf16.mxu1 %v4368_v39  ;;  %v4424_v38 = vcombine.high %v504_v33, %v508_v34  ;;  %v511_v39 = vld [vmem:[%s5159_s30 + $0x8c0] sm:$0xff] }
  0xde   : > { %v4429_v51 = vcombine.low %v511_v39, %v515_v40 }
  0xe0   : > { %3417 = vmatpush1.bf16.msra.mxu0 %v4365_v44  ;;  %3581 = vmatpush1.bf16.msra.mxu1 %v4367_v45  ;;  %v4423_v44 = vcombine.low %v504_v33, %v508_v34  ;;  %v4430_v45 = vcombine.high %v511_v39, %v515_v40  ;;  %v4471_v33 = vcombine.low %v552_v19, %v556_v20  ;;  %v572_v39 = vld [vmem:[%s5159_s30 + $0xaa8] sm:$0xff] }
  0xe1   : > { %3418 = vmatprep.subr.bf16.mxu0 %v4374_v46  ;;  %3582 = vmatprep.subr.bf16.mxu1 %v4376_v47  ;;  %v4432_v46 = vcombine.high %v512_v41, %v516_v42  ;;  %v519_v47 = vld [vmem:[%s5159_s30 + $0x900] sm:$0xff] }
  0xe2   : > { %v4437_v60 = vcombine.low %v519_v47, %v523_v48 }
  0xe4   : > { %3419 = vmatpush1.bf16.msra.mxu0 %v4373_v52  ;;  %3583 = vmatpush1.bf16.msra.mxu1 %v4375_v53  ;;  %v4431_v52 = vcombine.low %v512_v41, %v516_v42  ;;  %v4438_v53 = vcombine.high %v519_v47, %v523_v48  ;;  %v580_v47 = vld [vmem:[%s5159_s30 + $0xae8] sm:$0xff] }
  0xe5   : > { %3420 = vmatprep.subr.bf16.mxu0 %v4382_v54  ;;  %3584 = vmatprep.subr.bf16.mxu1 %v4384_v55  ;;  %v4440_v54 = vcombine.high %v520_v49, %v524_v50  ;;  %v527_v55 = vld [vmem:[%s5159_s30 + $0x940] sm:$0xff] }
  0xe6   : > { %v4445_v4 = vcombine.low %v527_v55, %v531_v56 }
  0xe8   : > { %3421 = vmatpush1.bf16.msra.mxu0 %v4381_v61  ;;  %3585 = vmatpush1.bf16.msra.mxu1 %v4383_v62  ;;  %v4439_v61 = vcombine.low %v520_v49, %v524_v50  ;;  %v4446_v62 = vcombine.high %v527_v55, %v531_v56  ;;  %v588_v55 = vld [vmem:[%s5159_s30 + $0xb28] sm:$0xff] }
  0xe9   : > { %3422 = vmatprep.subr.bf16.mxu0 %v4390_v63  ;;  %3586 = vmatprep.subr.bf16.mxu1 %v4392_v0  ;;  %v4448_v63 = vcombine.high %v528_v58, %v532_v59  ;;  %v535_v0 = vld [vmem:[%s5159_s30 + $0x980] sm:$0xff] }
  0xea   : > { %v4453_v13 = vcombine.low %v535_v0, %v539_v1 }
  0xec   : > { %3423 = vmatpush1.bf16.msra.mxu0 %v4389_v5  ;;  %3587 = vmatpush1.bf16.msra.mxu1 %v4391_v6  ;;  %v4447_v5 = vcombine.low %v528_v58, %v532_v59  ;;  %v4454_v6 = vcombine.high %v535_v0, %v539_v1  ;;  %v596_v0 = vld [vmem:[%s5159_s30 + $0xb68] sm:$0xff] }
  0xed   : > { %3424 = vmatprep.subr.bf16.mxu0 %v4398_v7  ;;  %3588 = vmatprep.subr.bf16.mxu1 %v4400_v8  ;;  %v4456_v7 = vcombine.high %v536_v2, %v540_v3  ;;  %v543_v8 = vld [vmem:[%s5159_s30 + $0x9c0] sm:$0xff] }
  0xee   : > { %v4462_v15 = vcombine.high %v543_v8, %v547_v9  ;;  %v4461_v23 = vcombine.low %v543_v8, %v547_v9  ;;  %v604_v8 = vld [vmem:[%s5159_s30 + $0xba8] sm:$0xff] }
  0xf0   : > { %3425 = vmatpush1.bf16.msra.mxu0 %v4397_v14  ;;  %3589 = vmatpush1.bf16.msra.mxu1 %v4399_v16  ;;  %v4455_v14 = vcombine.low %v536_v2, %v540_v3  ;;  %v4464_v16 = vcombine.high %v544_v10, %v548_v11 }
  0xf1   : > { %3435 = vmatprep.subr.bf16.mxu0 %v4406_v17  ;;  %3599 = vmatprep.subr.bf16.mxu1 %v4408_v18  ;;  %v551_v17 = vld [vmem:[%s5159_s30 + $0xa00] sm:$0xff] }
  0xf2   : > { %v555_v18 = vld [vmem:[%s5159_s30 + $0xa20] sm:$0xff] }
  0xf3   : > { %3427 = vmatmul.mubr.bf16.vlgmr.msra.gmra.mrb[0].mxu0 %v5315_v21  ;;  %3591 = vmatmul.mubr.bf16.vlgmr.msra.gmra.mrb[0].mxu1 %v5315_v21  ;;  %v4470_v25 = vcombine.high %v551_v17, %v555_v18  ;;  %v4469_v31 = vcombine.low %v551_v17, %v555_v18  ;;  %v612_v17 = vld [vmem:[%s5159_s30 + $0xbe8] sm:$0xff] }
  0xf4   : > { %3436 = vmatpush1.bf16.msra.mxu0 %v4405_v26  ;;  %3600 = vmatpush1.bf16.msra.mxu1 %v4407_v27  ;;  %v4472_v26 = vcombine.high %v552_v19, %v556_v20  ;;  %v559_v27 = vld [vmem:[%s5159_s30 + $0xa40] sm:$0xff] }
  0xf5   : > { %3437 = vmatprep.subr.bf16.mxu0 %v4414_v28  ;;  %3601 = vmatprep.subr.bf16.mxu1 %v4416_v29  ;;  %v563_v28 = vld [vmem:[%s5159_s30 + $0xa60] sm:$0xff]  ;;  %v560_v29 = vld [vmem:[%s5159_s30 + $0xa48] sm:$0xff] }
  0xf6   : > { %3467 = vmatprep.mubr.bf16.mxu0 %v5321_v32  ;;  %3631 = vmatprep.mubr.bf16.mxu1 %v5321_v32  ;;  %v4478_v34 = vcombine.high %v559_v27, %v563_v28  ;;  %v4477_v40 = vcombine.low %v559_v27, %v563_v28  ;;  %v4479_v41 = vcombine.low %v560_v29, %v564_v30  ;;  %v620_v27 = vld [vmem:[%s5159_s30 + $0xc28] sm:$0xff] }
  0xf8   : > { %3438 = vmatpush1.bf16.msra.mxu0 %v4413_v35  ;;  %3602 = vmatpush1.bf16.msra.mxu1 %v4415_v36  ;;  %v4480_v35 = vcombine.high %v560_v29, %v564_v30  ;;  %v567_v36 = vld [vmem:[%s5159_s30 + $0xa80] sm:$0xff] }
  0xf9   : > { %3439 = vmatprep.subr.bf16.mxu0 %v4422_v37  ;;  %3603 = vmatprep.subr.bf16.mxu1 %v4424_v38  ;;  %v571_v37 = vld [vmem:[%s5159_s30 + $0xaa0] sm:$0xff]  ;;  %v568_v38 = vld [vmem:[%s5159_s30 + $0xa88] sm:$0xff] }
  0xfa   : > { %v4486_v42 = vcombine.high %v567_v36, %v571_v37  ;;  %v4485_v48 = vcombine.low %v567_v36, %v571_v37  ;;  %v4487_v49 = vcombine.low %v568_v38, %v572_v39  ;;  %v219_v29 = vld [vmem:[#allocation2 + $0x20] sm:$0xff]  ;;  %v624_v37 = vld [vmem:[%s5159_s30 + $0xc48] sm:$0xff] }
  0xfb   : > { %v5387_v36 = vpack.c.bf16 %v219_v29, %v219_v29 }
  0xfc   : > { %3440 = vmatpush1.bf16.msra.mxu0 %v4421_v43  ;;  %3604 = vmatpush1.bf16.msra.mxu1 %v4423_v44  ;;  %v4488_v43 = vcombine.high %v568_v38, %v572_v39  ;;  %v575_v44 = vld [vmem:[%s5159_s30 + $0xac0] sm:$0xff]  ;;  %v628_v38 = vld [vmem:[%s5159_s30 + $0xc68] sm:$0xff]  ;;  %v222_v39 = vld [vmem:[#allocation2 + $0x38] sm:$0xff] }
  0xfd   : > { %3441 = vmatprep.subr.bf16.mxu0 %v4430_v45  ;;  %3605 = vmatprep.subr.bf16.mxu1 %v4432_v46  ;;  %v579_v45 = vld [vmem:[%s5159_s30 + $0xae0] sm:$0xff]  ;;  %v576_v46 = vld [vmem:[%s5159_s30 + $0xac8] sm:$0xff] }
  0xfe   : > { %v4494_v50 = vcombine.high %v575_v44, %v579_v45  ;;  %v4493_v56 = vcombine.low %v575_v44, %v579_v45  ;;  %v4495_v58 = vcombine.low %v576_v46, %v580_v47  ;;  %v631_v44 = vld [vmem:[%s5159_s30 + $0xc80] sm:$0xff] }
  0xff   : > { %v635_v45 = vld [vmem:[%s5159_s30 + $0xca0] sm:$0xff] }
 0x100   : > { %3442 = vmatpush1.bf16.msra.mxu0 %v4429_v51  ;;  %3606 = vmatpush1.bf16.msra.mxu1 %v4431_v52  ;;  %v4496_v51 = vcombine.high %v576_v46, %v580_v47  ;;  %v583_v52 = vld [vmem:[%s5159_s30 + $0xb00] sm:$0xff]  ;;  %v5393_v46 = vpack.c.bf16 %v222_v39, %v222_v39  ;;  %v632_v47 = vld [vmem:[%s5159_s30 + $0xc88] sm:$0xff] }
 0x101   : > { %3443 = vmatprep.subr.bf16.mxu0 %v4438_v53  ;;  %3607 = vmatprep.subr.bf16.mxu1 %v4440_v54  ;;  %v587_v53 = vld [vmem:[%s5159_s30 + $0xb20] sm:$0xff]  ;;  %v584_v54 = vld [vmem:[%s5159_s30 + $0xb08] sm:$0xff] }
 0x102   : > { %v4502_v59 = vcombine.high %v583_v52, %v587_v53  ;;  %v4501_v1 = vcombine.low %v583_v52, %v587_v53  ;;  %v4503_v2 = vcombine.low %v584_v54, %v588_v55  ;;  %v639_v53 = vld [vmem:[%s5159_s30 + $0xcc0] sm:$0xff] }
 0x104   : > { %3444 = vmatpush1.bf16.msra.mxu0 %v4437_v60  ;;  %3608 = vmatpush1.bf16.msra.mxu1 %v4439_v61  ;;  %v4504_v60 = vcombine.high %v584_v54, %v588_v55  ;;  %v591_v61 = vld [vmem:[%s5159_s30 + $0xb40] sm:$0xff]  ;;  %v640_v55 = vld [vmem:[%s5159_s30 + $0xcc8] sm:$0xff] }
 0x105   : > { %3445 = vmatprep.subr.bf16.mxu0 %v4446_v62  ;;  %3609 = vmatprep.subr.bf16.mxu1 %v4448_v63  ;;  %v595_v62 = vld [vmem:[%s5159_s30 + $0xb60] sm:$0xff]  ;;  %v592_v63 = vld [vmem:[%s5159_s30 + $0xb48] sm:$0xff] }
 0x106   : > { %v4510_v3 = vcombine.high %v591_v61, %v595_v62  ;;  %v4509_v9 = vcombine.low %v591_v61, %v595_v62  ;;  %v4511_v10 = vcombine.low %v592_v63, %v596_v0  ;;  %v643_v54 = vld [vmem:[%s5159_s30 + $0xce0] sm:$0xff] }
 0x107   : > { %v647_v62 = vld [vmem:[%s5159_s30 + $0xd00] sm:$0xff] }
 0x108   : > { %3446 = vmatpush1.bf16.msra.mxu0 %v4445_v4  ;;  %3610 = vmatpush1.bf16.msra.mxu1 %v4447_v5  ;;  %v4512_v4 = vcombine.high %v592_v63, %v596_v0  ;;  %v599_v5 = vld [vmem:[%s5159_s30 + $0xb80] sm:$0xff]  ;;  %v648_v0 = vld [vmem:[%s5159_s30 + $0xd08] sm:$0xff] }
 0x109   : > { %3447 = vmatprep.subr.bf16.mxu0 %v4454_v6  ;;  %3611 = vmatprep.subr.bf16.mxu1 %v4456_v7  ;;  %v603_v6 = vld [vmem:[%s5159_s30 + $0xba0] sm:$0xff]  ;;  %v600_v7 = vld [vmem:[%s5159_s30 + $0xb88] sm:$0xff] }
 0x10a   : > { %v4518_v11 = vcombine.high %v599_v5, %v603_v6  ;;  %v4517_v18 = vcombine.low %v599_v5, %v603_v6  ;;  %v4519_v19 = vcombine.low %v600_v7, %v604_v8  ;;  %v651_v63 = vld [vmem:[%s5159_s30 + $0xd20] sm:$0xff] }
 0x10b   : > { %v655_v6 = vld [vmem:[%s5159_s30 + $0xd40] sm:$0xff] }
 0x10c   : > { %3448 = vmatpush1.bf16.msra.mxu0 %v4453_v13  ;;  %3612 = vmatpush1.bf16.msra.mxu1 %v4455_v14  ;;  %v4520_v13 = vcombine.high %v600_v7, %v604_v8  ;;  %v607_v14 = vld [vmem:[%s5159_s30 + $0xbc0] sm:$0xff]  ;;  %v656_v8 = vld [vmem:[%s5159_s30 + $0xd48] sm:$0xff] }
 0x10d   : > { %3449 = vmatprep.subr.bf16.mxu0 %v4462_v15  ;;  %3613 = vmatprep.subr.bf16.mxu1 %v4464_v16  ;;  %v611_v15 = vld [vmem:[%s5159_s30 + $0xbe0] sm:$0xff]  ;;  %v608_v16 = vld [vmem:[%s5159_s30 + $0xbc8] sm:$0xff] }
 0x10e   : > { %v4526_v20 = vcombine.high %v607_v14, %v611_v15  ;;  %v4525_v28 = vcombine.low %v607_v14, %v611_v15  ;;  %v4527_v30 = vcombine.low %v608_v16, %v612_v17  ;;  %v659_v7 = vld [vmem:[%s5159_s30 + $0xd60] sm:$0xff] }
 0x10f   : > { %v663_v15 = vld [vmem:[%s5159_s30 + $0xd80] sm:$0xff] }
 0x110   : > { %3450 = vmatpush1.bf16.msra.mxu0 %v4461_v23  ;;  %3614 = vmatpush1.bf16.msra.mxu1 %v4463_v24  ;;  %v4528_v23 = vcombine.high %v608_v16, %v612_v17  ;;  %v615_v24 = vld [vmem:[%s5159_s30 + $0xc00] sm:$0xff]  ;;  %v664_v17 = vld [vmem:[%s5159_s30 + $0xd88] sm:$0xff] }
 0x111   : > { %3451 = vmatprep.subr.bf16.mxu0 %v4470_v25  ;;  %3615 = vmatprep.subr.bf16.mxu1 %v4472_v26  ;;  %v619_v25 = vld [vmem:[%s5159_s30 + $0xc20] sm:$0xff]  ;;  %v616_v26 = vld [vmem:[%s5159_s30 + $0xc08] sm:$0xff] }
 0x112   : > { %v667_v16 = vld [vmem:[%s5159_s30 + $0xda0] sm:$0xff] }
 0x113   : > { %v4581_v29 = vcombine.low %v663_v15, %v667_v16 }
 0x114   : > { %3452 = vmatpush1.bf16.msra.mxu0 %v4469_v31  ;;  %3616 = vmatpush1.bf16.msra.mxu1 %v4471_v33  ;;  %v4534_v31 = vcombine.high %v615_v24, %v619_v25  ;;  %v4536_v33 = vcombine.high %v616_v26, %v620_v27 }
 0x115   : > { %3453 = vmatprep.subr.bf16.mxu0 %v4478_v34  ;;  %3617 = vmatprep.subr.bf16.mxu1 %v4480_v35  ;;  %v623_v34 = vld [vmem:[%s5159_s30 + $0xc40] sm:$0xff] }
 0x116   : > { %v627_v35 = vld [vmem:[%s5159_s30 + $0xc60] sm:$0xff] }
 0x118   : > { %3454 = vmatpush1.bf16.msra.mxu0 %v4477_v40  ;;  %3618 = vmatpush1.bf16.msra.mxu1 %v4479_v41  ;;  %v4533_v40 = vcombine.low %v615_v24, %v619_v25  ;;  %v4535_v41 = vcombine.low %v616_v26, %v620_v27  ;;  %v671_v25 = vld [vmem:[%s5159_s30 + $0xdc0] sm:$0xff]  ;;  %v672_v27 = vld [vmem:[%s5159_s30 + $0xdc8] sm:$0xff] }
 0x119   : > { %3455 = vmatprep.subr.bf16.mxu0 %v4486_v42  ;;  %3619 = vmatprep.subr.bf16.mxu1 %v4488_v43  ;;  %v4542_v42 = vcombine.high %v623_v34, %v627_v35  ;;  %v4544_v43 = vcombine.high %v624_v37, %v628_v38  ;;  %v675_v26 = vld [vmem:[%s5159_s30 + $0xde0] sm:$0xff] }
 0x11a   : > { %v4589_v39 = vcombine.low %v671_v25, %v675_v26 }
 0x11c   : > { %3456 = vmatpush1.bf16.msra.mxu0 %v4485_v48  ;;  %3620 = vmatpush1.bf16.msra.mxu1 %v4487_v49  ;;  %v636_v48 = vld [vmem:[%s5159_s30 + $0xca8] sm:$0xff]  ;;  %v4541_v49 = vcombine.low %v623_v34, %v627_v35  ;;  %v679_v34 = vld [vmem:[%s5159_s30 + $0xe00] sm:$0xff] }
 0x11d   : > { %3457 = vmatprep.subr.bf16.mxu0 %v4494_v50  ;;  %3621 = vmatprep.subr.bf16.mxu1 %v4496_v51  ;;  %v4543_v50 = vcombine.low %v624_v37, %v628_v38  ;;  %v4550_v51 = vcombine.high %v631_v44, %v635_v45  ;;  %v4552_v52 = vcombine.high %v632_v47, %v636_v48  ;;  %v683_v35 = vld [vmem:[%s5159_s30 + $0xe20] sm:$0xff]  ;;  %v680_v37 = vld [vmem:[%s5159_s30 + $0xe08] sm:$0xff] }
 0x11e   : > { %v684_v38 = vld [vmem:[%s5159_s30 + $0xe28] sm:$0xff] }
 0x120   : > { %3458 = vmatpush1.bf16.msra.mxu0 %v4493_v56  ;;  %3622 = vmatpush1.bf16.msra.mxu1 %v4495_v58  ;;  %v644_v56 = vld [vmem:[%s5159_s30 + $0xce8] sm:$0xff]  ;;  %v4549_v58 = vcombine.low %v631_v44, %v635_v45  ;;  %v691_v44 = vld [vmem:[%s5159_s30 + $0xe60] sm:$0xff] }
 0x121   : > { %3459 = vmatprep.subr.bf16.mxu0 %v4502_v59  ;;  %3623 = vmatprep.subr.bf16.mxu1 %v4504_v60  ;;  %v4551_v59 = vcombine.low %v632_v47, %v636_v48  ;;  %v4558_v60 = vcombine.high %v639_v53, %v643_v54  ;;  %v4560_v61 = vcombine.high %v640_v55, %v644_v56  ;;  %v688_v45 = vld [vmem:[%s5159_s30 + $0xe48] sm:$0xff] }
 0x122   : > { %v692_v47 = vld [vmem:[%s5159_s30 + $0xe68] sm:$0xff]  ;;  %v4597_v48 = vcombine.low %v679_v34, %v683_v35 }
 0x124   : > { %3460 = vmatpush1.bf16.msra.mxu0 %v4501_v1  ;;  %3624 = vmatpush1.bf16.msra.mxu1 %v4503_v2  ;;  %v652_v1 = vld [vmem:[%s5159_s30 + $0xd28] sm:$0xff]  ;;  %v4557_v2 = vcombine.low %v639_v53, %v643_v54  ;;  %v699_v53 = vld [vmem:[%s5159_s30 + $0xea0] sm:$0xff] }
 0x125   : > { %3461 = vmatprep.subr.bf16.mxu0 %v4510_v3  ;;  %3625 = vmatprep.subr.bf16.mxu1 %v4512_v4  ;;  %v4559_v3 = vcombine.low %v640_v55, %v644_v56  ;;  %v4566_v4 = vcombine.high %v647_v62, %v651_v63  ;;  %v4568_v5 = vcombine.high %v648_v0, %v652_v1  ;;  %v696_v54 = vld [vmem:[%s5159_s30 + $0xe88] sm:$0xff] }
 0x126   : > { %v700_v55 = vld [vmem:[%s5159_s30 + $0xea8] sm:$0xff] }
 0x128   : > { %3462 = vmatpush1.bf16.msra.mxu0 %v4509_v9  ;;  %3626 = vmatpush1.bf16.msra.mxu1 %v4511_v10  ;;  %v660_v9 = vld [vmem:[%s5159_s30 + $0xd68] sm:$0xff]  ;;  %v4565_v10 = vcombine.low %v647_v62, %v651_v63  ;;  %v707_v62 = vld [vmem:[%s5159_s30 + $0xee0] sm:$0xff] }
 0x129   : > { %3463 = vmatprep.subr.bf16.mxu0 %v4518_v11  ;;  %3627 = vmatprep.subr.bf16.mxu1 %v4520_v13  ;;  %v4567_v11 = vcombine.low %v648_v0, %v652_v1  ;;  %v4574_v13 = vcombine.high %v655_v6, %v659_v7  ;;  %v4576_v14 = vcombine.high %v656_v8, %v660_v9  ;;  %v704_v63 = vld [vmem:[%s5159_s30 + $0xec8] sm:$0xff] }
 0x12a   : > { %v708_v0 = vld [vmem:[%s5159_s30 + $0xee8] sm:$0xff] }
 0x12c   : > { %3464 = vmatpush1.bf16.msra.mxu0 %v4517_v18  ;;  %3628 = vmatpush1.bf16.msra.mxu1 %v4519_v19  ;;  %v668_v18 = vld [vmem:[%s5159_s30 + $0xda8] sm:$0xff]  ;;  %v4573_v19 = vcombine.low %v655_v6, %v659_v7  ;;  %v715_v6 = vld [vmem:[%s5159_s30 + $0xf20] sm:$0xff] }
 0x12d   : > { %3465 = vmatprep.subr.bf16.mxu0 %v4526_v20  ;;  %3629 = vmatprep.subr.bf16.mxu1 %v4528_v23  ;;  %v4575_v20 = vcombine.low %v656_v8, %v660_v9  ;;  %v4582_v23 = vcombine.high %v663_v15, %v667_v16  ;;  %v4584_v24 = vcombine.high %v664_v17, %v668_v18  ;;  %v712_v7 = vld [vmem:[%s5159_s30 + $0xf08] sm:$0xff]  ;;  %v723_v15 = vld [vmem:[%s5159_s30 + $0xf60] sm:$0xff] }
 0x12e   : > { %v716_v8 = vld [vmem:[%s5159_s30 + $0xf28] sm:$0xff] }
 0x12f   : > { %v720_v16 = vld [vmem:[%s5159_s30 + $0xf48] sm:$0xff] }
 0x130   : > { %3466 = vmatpush1.bf16.msra.mxu0 %v4525_v28  ;;  %3630 = vmatpush1.bf16.msra.mxu1 %v4527_v30  ;;  %v676_v28 = vld [vmem:[%s5159_s30 + $0xde8] sm:$0xff]  ;;  %v4583_v30 = vcombine.low %v664_v17, %v668_v18 }
 0x131   : > { %3476 = vmatprep.subr.bf16.mxu0 %v4534_v31  ;;  %3640 = vmatprep.subr.bf16.mxu1 %v4536_v33  ;;  %v4590_v31 = vcombine.high %v671_v25, %v675_v26  ;;  %v4592_v33 = vcombine.high %v672_v27, %v676_v28  ;;  %v724_v17 = vld [vmem:[%s5159_s30 + $0xf68] sm:$0xff]  ;;  %v731_v25 = vld [vmem:[%s5159_s30 + $0xfa0] sm:$0xff] }
 0x132   : > { %v728_v26 = vld [vmem:[%s5159_s30 + $0xf88] sm:$0xff] }
 0x133   : > { %3468 = vmatmul.mubr.bf16.vlgmr.msra.gmra.mrb[0].mxu0 %v5387_v36  ;;  %3632 = vmatmul.mubr.bf16.vlgmr.msra.gmra.mrb[0].mxu1 %v5387_v36 }
 0x134   : > { %3477 = vmatpush1.bf16.msra.mxu0 %v4533_v40  ;;  %3641 = vmatpush1.bf16.msra.mxu1 %v4535_v41  ;;  %v4591_v40 = vcombine.low %v672_v27, %v676_v28  ;;  %v4598_v41 = vcombine.high %v679_v34, %v683_v35  ;;  %v732_v27 = vld [vmem:[%s5159_s30 + $0xfa8] sm:$0xff]  ;;  %v739_v34 = vld [vmem:[%s5159_s30 + $0xfe0] sm:$0xff] }
 0x135   : > { %3478 = vmatprep.subr.bf16.mxu0 %v4542_v42  ;;  %3642 = vmatprep.subr.bf16.mxu1 %v4544_v43  ;;  %v4600_v42 = vcombine.high %v680_v37, %v684_v38  ;;  %v687_v43 = vld [vmem:[%s5159_s30 + $0xe40] sm:$0xff]  ;;  %v736_v35 = vld [vmem:[%s5159_s30 + $0xfc8] sm:$0xff] }
 0x136   : > { %3508 = vmatprep.mubr.bf16.mxu0 %v5393_v46  ;;  %3672 = vmatprep.mubr.bf16.mxu1 %v5393_v46  ;;  %v4605_v56 = vcombine.low %v687_v43, %v691_v44 }
 0x138   : > { %3479 = vmatpush1.bf16.msra.mxu0 %v4541_v49  ;;  %3643 = vmatpush1.bf16.msra.mxu1 %v4543_v50  ;;  %v4599_v49 = vcombine.low %v680_v37, %v684_v38  ;;  %v4606_v50 = vcombine.high %v687_v43, %v691_v44  ;;  %v740_v37 = vld [vmem:[%s5159_s30 + $0xfe8] sm:$0xff]  ;;  %v237_v43 = vld [vmem:[%s5159_s30 + $0x30] sm:$0xff]  ;;  %v234_v44 = vld [vmem:[%s5159_s30 + $0x18] sm:$0xff] }
 0x139   : > { %3480 = vmatprep.subr.bf16.mxu0 %v4550_v51  ;;  %3644 = vmatprep.subr.bf16.mxu1 %v4552_v52  ;;  %v4608_v51 = vcombine.high %v688_v45, %v692_v47  ;;  %v695_v52 = vld [vmem:[%s5159_s30 + $0xe80] sm:$0xff] }
 0x13a   : > { %v4613_v1 = vcombine.low %v695_v52, %v699_v53 }
 0x13c   : > { %3481 = vmatpush1.bf16.msra.mxu0 %v4549_v58  ;;  %3645 = vmatpush1.bf16.msra.mxu1 %v4551_v59  ;;  %v4607_v58 = vcombine.low %v688_v45, %v692_v47  ;;  %v4614_v59 = vcombine.high %v695_v52, %v699_v53  ;;  %v238_v45 = vld [vmem:[%s5159_s30 + $0x38] sm:$0xff]  ;;  %v241_v52 = vld [vmem:[%s5159_s30 + $0x50] sm:$0xff] }
 0x13d   : > { %3482 = vmatprep.subr.bf16.mxu0 %v4558_v60  ;;  %3646 = vmatprep.subr.bf16.mxu1 %v4560_v61  ;;  %v4616_v60 = vcombine.high %v696_v54, %v700_v55  ;;  %v703_v61 = vld [vmem:[%s5159_s30 + $0xec0] sm:$0xff]  ;;  %v245_v53 = vld [vmem:[%s5159_s30 + $0x70] sm:$0xff] }
 0x13e   : > { %v4621_v9 = vcombine.low %v703_v61, %v707_v62 }
 0x140   : > { %3483 = vmatpush1.bf16.msra.mxu0 %v4557_v2  ;;  %3647 = vmatpush1.bf16.msra.mxu1 %v4559_v3  ;;  %v4615_v2 = vcombine.low %v696_v54, %v700_v55  ;;  %v4622_v3 = vcombine.high %v703_v61, %v707_v62  ;;  %v242_v55 = vld [vmem:[%s5159_s30 + $0x58] sm:$0xff]  ;;  %v249_v62 = vld [vmem:[%s5159_s30 + $0x90] sm:$0xff] }
 0x141   : > { %3484 = vmatprep.subr.bf16.mxu0 %v4566_v4  ;;  %3648 = vmatprep.subr.bf16.mxu1 %v4568_v5  ;;  %v4624_v4 = vcombine.high %v704_v63, %v708_v0  ;;  %v711_v5 = vld [vmem:[%s5159_s30 + $0xf00] sm:$0xff] }
 0x142   : > { %v4629_v18 = vcombine.low %v711_v5, %v715_v6 }
 0x144   : > { %3485 = vmatpush1.bf16.msra.mxu0 %v4565_v10  ;;  %3649 = vmatpush1.bf16.msra.mxu1 %v4567_v11  ;;  %v4623_v10 = vcombine.low %v704_v63, %v708_v0  ;;  %v4630_v11 = vcombine.high %v711_v5, %v715_v6  ;;  %v253_v63 = vld [vmem:[%s5159_s30 + $0xb0] sm:$0xff]  ;;  %v250_v0 = vld [vmem:[%s5159_s30 + $0x98] sm:$0xff] }
 0x145   : > { %3486 = vmatprep.subr.bf16.mxu0 %v4574_v13  ;;  %3650 = vmatprep.subr.bf16.mxu1 %v4576_v14  ;;  %v4632_v13 = vcombine.high %v712_v7, %v716_v8  ;;  %v719_v14 = vld [vmem:[%s5159_s30 + $0xf40] sm:$0xff]  ;;  %v257_v6 = vld [vmem:[%s5159_s30 + $0xd0] sm:$0xff] }
 0x146   : > { %v4637_v28 = vcombine.low %v719_v14, %v723_v15 }
 0x148   : > { %3487 = vmatpush1.bf16.msra.mxu0 %v4573_v19  ;;  %3651 = vmatpush1.bf16.msra.mxu1 %v4575_v20  ;;  %v4631_v19 = vcombine.low %v712_v7, %v716_v8  ;;  %v4638_v20 = vcombine.high %v719_v14, %v723_v15  ;;  %v261_v7 = vld [vmem:[%s5159_s30 + $0xf0] sm:$0xff]  ;;  %v258_v8 = vld [vmem:[%s5159_s30 + $0xd8] sm:$0xff] }
 0x149   : > { %3488 = vmatprep.subr.bf16.mxu0 %v4582_v23  ;;  %3652 = vmatprep.subr.bf16.mxu1 %v4584_v24  ;;  %v4640_v23 = vcombine.high %v720_v16, %v724_v17  ;;  %v727_v24 = vld [vmem:[%s5159_s30 + $0xf80] sm:$0xff]  ;;  %v265_v15 = vld [vmem:[%s5159_s30 + $0x110] sm:$0xff] }
 0x14a   : > { %v4645_v38 = vcombine.low %v727_v24, %v731_v25 }
 0x14c   : > { %3489 = vmatpush1.bf16.msra.mxu0 %v4581_v29  ;;  %3653 = vmatpush1.bf16.msra.mxu1 %v4583_v30  ;;  %v4639_v29 = vcombine.low %v720_v16, %v724_v17  ;;  %v4646_v30 = vcombine.high %v727_v24, %v731_v25  ;;  %v269_v16 = vld [vmem:[%s5159_s30 + $0x130] sm:$0xff]  ;;  %v266_v17 = vld [vmem:[%s5159_s30 + $0x118] sm:$0xff] }
 0x14d   : > { %3490 = vmatprep.subr.bf16.mxu0 %v4590_v31  ;;  %3654 = vmatprep.subr.bf16.mxu1 %v4592_v33  ;;  %v4648_v31 = vcombine.high %v728_v26, %v732_v27  ;;  %v735_v33 = vld [vmem:[%s5159_s30 + $0xfc0] sm:$0xff]  ;;  %v273_v24 = vld [vmem:[%s5159_s30 + $0x150] sm:$0xff] }
 0x14e   : > { %v4653_v47 = vcombine.low %v735_v33, %v739_v34  ;;  %v277_v25 = vld [vmem:[%s5159_s30 + $0x170] sm:$0xff] }
 0x150   : > { %3491 = vmatpush1.bf16.msra.mxu0 %v4589_v39  ;;  %3655 = vmatpush1.bf16.msra.mxu1 %v4591_v40  ;;  %v4647_v39 = vcombine.low %v728_v26, %v732_v27  ;;  %v4654_v40 = vcombine.high %v735_v33, %v739_v34  ;;  %v274_v26 = vld [vmem:[%s5159_s30 + $0x158] sm:$0xff]  ;;  %v281_v33 = vld [vmem:[%s5159_s30 + $0x190] sm:$0xff] }
 0x151   : > { %3492 = vmatprep.subr.bf16.mxu0 %v4598_v41  ;;  %3656 = vmatprep.subr.bf16.mxu1 %v4600_v42  ;;  %v4656_v41 = vcombine.high %v736_v35, %v740_v37  ;;  %v233_v42 = vld [vmem:[%s5159_s30 + $0x10] sm:$0xff]  ;;  %v278_v27 = vld [vmem:[%s5159_s30 + $0x178] sm:$0xff] }
 0x152   : > { %v285_v34 = vld [vmem:[%s5159_s30 + $0x1b0] sm:$0xff] }
 0x154   : > { %3493 = vmatpush1.bf16.msra.mxu0 %v4597_v48  ;;  %3657 = vmatpush1.bf16.msra.mxu1 %v4599_v49  ;;  %v221_v48 = vld [vmem:[#allocation2 + $0x30] sm:$0xff]  ;;  %v4655_v49 = vcombine.low %v736_v35, %v740_v37  ;;  %v282_v35 = vld [vmem:[%s5159_s30 + $0x198] sm:$0xff] }
 0x155   : > { %3494 = vmatprep.subr.bf16.mxu0 %v4606_v50  ;;  %3658 = vmatprep.subr.bf16.mxu1 %v4608_v51  ;;  %v4154_v50 = vcombine.high %v233_v42, %v237_v43  ;;  %v4156_v51 = vcombine.high %v234_v44, %v238_v45  ;;  %v5459_v54 = vpack.c.bf16 %v221_v48, %v221_v48  ;;  %v286_v37 = vld [vmem:[%s5159_s30 + $0x1b8] sm:$0xff] }
 0x156   : > { %v4203_v48 = vcombine.low %v282_v35, %v286_v37 }
 0x158   : > { %3495 = vmatpush1.bf16.msra.mxu0 %v4605_v56  ;;  %3659 = vmatpush1.bf16.msra.mxu1 %v4607_v58  ;;  %v246_v56 = vld [vmem:[%s5159_s30 + $0x78] sm:$0xff]  ;;  %v4153_v58 = vcombine.low %v233_v42, %v237_v43  ;;  %v289_v42 = vld [vmem:[%s5159_s30 + $0x1d0] sm:$0xff] }
 0x159   : > { %3496 = vmatprep.subr.bf16.mxu0 %v4614_v59  ;;  %3660 = vmatprep.subr.bf16.mxu1 %v4616_v60  ;;  %v4155_v59 = vcombine.low %v234_v44, %v238_v45  ;;  %v4162_v60 = vcombine.high %v241_v52, %v245_v53  ;;  %v4164_v61 = vcombine.high %v242_v55, %v246_v56  ;;  %v293_v43 = vld [vmem:[%s5159_s30 + $0x1f0] sm:$0xff]  ;;  %v290_v44 = vld [vmem:[%s5159_s30 + $0x1d8] sm:$0xff] }
 0x15a   : > { %v294_v45 = vld [vmem:[%s5159_s30 + $0x1f8] sm:$0xff] }
 0x15c   : > { %3497 = vmatpush1.bf16.msra.mxu0 %v4613_v1  ;;  %3661 = vmatpush1.bf16.msra.mxu1 %v4615_v2  ;;  %v254_v1 = vld [vmem:[%s5159_s30 + $0xb8] sm:$0xff]  ;;  %v4161_v2 = vcombine.low %v241_v52, %v245_v53  ;;  %v301_v52 = vld [vmem:[%s5159_s30 + $0x230] sm:$0xff] }
 0x15d   : > { %3498 = vmatprep.subr.bf16.mxu0 %v4622_v3  ;;  %3662 = vmatprep.subr.bf16.mxu1 %v4624_v4  ;;  %v4163_v3 = vcombine.low %v242_v55, %v246_v56  ;;  %v4170_v4 = vcombine.high %v249_v62, %v253_v63  ;;  %v4172_v5 = vcombine.high %v250_v0, %v254_v1  ;;  %v298_v53 = vld [vmem:[%s5159_s30 + $0x218] sm:$0xff] }
 0x15e   : > { %v302_v55 = vld [vmem:[%s5159_s30 + $0x238] sm:$0xff]  ;;  %v4209_v56 = vcombine.low %v289_v42, %v293_v43 }
 0x160   : > { %3499 = vmatpush1.bf16.msra.mxu0 %v4621_v9  ;;  %3663 = vmatpush1.bf16.msra.mxu1 %v4623_v10  ;;  %v262_v9 = vld [vmem:[%s5159_s30 + $0xf8] sm:$0xff]  ;;  %v4169_v10 = vcombine.low %v249_v62, %v253_v63  ;;  %v309_v62 = vld [vmem:[%s5159_s30 + $0x270] sm:$0xff] }
 0x161   : > { %3500 = vmatprep.subr.bf16.mxu0 %v4630_v11  ;;  %3664 = vmatprep.subr.bf16.mxu1 %v4632_v13  ;;  %v4171_v11 = vcombine.low %v250_v0, %v254_v1  ;;  %v4178_v13 = vcombine.high %v257_v6, %v261_v7  ;;  %v4180_v14 = vcombine.high %v258_v8, %v262_v9  ;;  %v306_v63 = vld [vmem:[%s5159_s30 + $0x258] sm:$0xff] }
 0x162   : > { %v310_v0 = vld [vmem:[%s5159_s30 + $0x278] sm:$0xff] }
 0x164   : > { %3501 = vmatpush1.bf16.msra.mxu0 %v4629_v18  ;;  %3665 = vmatpush1.bf16.msra.mxu1 %v4631_v19  ;;  %v270_v18 = vld [vmem:[%s5159_s30 + $0x138] sm:$0xff]  ;;  %v4177_v19 = vcombine.low %v257_v6, %v261_v7  ;;  %v317_v6 = vld [vmem:[%s5159_s30 + $0x2b0] sm:$0xff] }
 0x165   : > { %3502 = vmatprep.subr.bf16.mxu0 %v4638_v20  ;;  %3666 = vmatprep.subr.bf16.mxu1 %v4640_v23  ;;  %v4186_v20 = vcombine.high %v265_v15, %v269_v16  ;;  %v4188_v23 = vcombine.high %v266_v17, %v270_v18  ;;  %v314_v7 = vld [vmem:[%s5159_s30 + $0x298] sm:$0xff] }
 0x168   : > { %3503 = vmatpush1.bf16.msra.mxu0 %v4637_v28  ;;  %3667 = vmatpush1.bf16.msra.mxu1 %v4639_v29  ;;  %v4185_v28 = vcombine.low %v265_v15, %v269_v16  ;;  %v4187_v29 = vcombine.low %v266_v17, %v270_v18  ;;  %v325_v15 = vld [vmem:[%s5159_s30 + $0x2f0] sm:$0xff]  ;;  %v322_v16 = vld [vmem:[%s5159_s30 + $0x2d8] sm:$0xff] }
 0x169   : > { %3504 = vmatprep.subr.bf16.mxu0 %v4646_v30  ;;  %3668 = vmatprep.subr.bf16.mxu1 %v4648_v31  ;;  %v4194_v30 = vcombine.high %v273_v24, %v277_v25  ;;  %v4196_v31 = vcombine.high %v274_v26, %v278_v27  ;;  %v326_v17 = vld [vmem:[%s5159_s30 + $0x2f8] sm:$0xff] }
 0x16c   : > { %3505 = vmatpush1.bf16.msra.mxu0 %v4645_v38  ;;  %3669 = vmatpush1.bf16.msra.mxu1 %v4647_v39  ;;  %v4193_v38 = vcombine.low %v273_v24, %v277_v25  ;;  %v4195_v39 = vcombine.low %v274_v26, %v278_v27  ;;  %v333_v24 = vld [vmem:[%s5159_s30 + $0x330] sm:$0xff]  ;;  %v330_v25 = vld [vmem:[%s5159_s30 + $0x318] sm:$0xff] }
 0x16d   : > { %3506 = vmatprep.subr.bf16.mxu0 %v4654_v40  ;;  %3670 = vmatprep.subr.bf16.mxu1 %v4656_v41  ;;  %v4202_v40 = vcombine.high %v281_v33, %v285_v34  ;;  %v4204_v41 = vcombine.high %v282_v35, %v286_v37  ;;  %v334_v26 = vld [vmem:[%s5159_s30 + $0x338] sm:$0xff] }
 0x16e   : > { %v342_v35 = vld [vmem:[%s5159_s30 + $0x378] sm:$0xff] }
 0x170   : > { %3507 = vmatpush1.bf16.msra.mxu0 %v4653_v47  ;;  %3671 = vmatpush1.bf16.msra.mxu1 %v4655_v49  ;;  %v4201_v47 = vcombine.low %v281_v33, %v285_v34  ;;  %v4210_v49 = vcombine.high %v289_v42, %v293_v43  ;;  %v341_v33 = vld [vmem:[%s5159_s30 + $0x370] sm:$0xff]  ;;  %v338_v34 = vld [vmem:[%s5159_s30 + $0x358] sm:$0xff] }
 0x171   : > { %3681 = vmatprep.subr.bf16.mxu0 %v4154_v50  ;;  %3845 = vmatprep.subr.bf16.mxu1 %v4156_v51  ;;  %v4212_v50 = vcombine.high %v290_v44, %v294_v45  ;;  %v297_v51 = vld [vmem:[%s5159_s30 + $0x210] sm:$0xff]  ;;  %v346_v43 = vld [vmem:[%s5159_s30 + $0x398] sm:$0xff] }
 0x172   : > { %v4217_v1 = vcombine.low %v297_v51, %v301_v52  ;;  %v349_v42 = vld [vmem:[%s5159_s30 + $0x3b0] sm:$0xff] }
 0x173   : > { %3509 = vmatmul.mubr.bf16.vlgmr.msra.gmra.mrb[0].mxu0 %v5459_v54  ;;  %3673 = vmatmul.mubr.bf16.vlgmr.msra.gmra.mrb[0].mxu1 %v5459_v54 }
 0x174   : > { %3682 = vmatpush1.bf16.msra.mxu0 %v4153_v58  ;;  %3846 = vmatpush1.bf16.msra.mxu1 %v4155_v59  ;;  %v4211_v58 = vcombine.low %v290_v44, %v294_v45  ;;  %v4218_v59 = vcombine.high %v297_v51, %v301_v52  ;;  %v350_v44 = vld [vmem:[%s5159_s30 + $0x3b8] sm:$0xff]  ;;  %v357_v51 = vld [vmem:[%s5159_s30 + $0x3f0] sm:$0xff] }
 0x175   : > { %3683 = vmatprep.subr.bf16.mxu0 %v4162_v60  ;;  %3847 = vmatprep.subr.bf16.mxu1 %v4164_v61  ;;  %v4220_v60 = vcombine.high %v298_v53, %v302_v55  ;;  %v305_v61 = vld [vmem:[%s5159_s30 + $0x250] sm:$0xff]  ;;  %v354_v52 = vld [vmem:[%s5159_s30 + $0x3d8] sm:$0xff] }
 0x176   : > { %3713 = vmatprep.mubr.bf16.mxu0 %v5199_v57  ;;  %3877 = vmatprep.mubr.bf16.mxu1 %v5199_v57  ;;  %v4179_v57 = vcombine.low %v258_v8, %v262_v9  ;;  %v318_v8 = vld [vmem:[%s5159_s30 + $0x2b8] sm:$0xff]  ;;  %v4225_v9 = vcombine.low %v305_v61, %v309_v62 }
 0x178   : > { %3684 = vmatpush1.bf16.msra.mxu0 %v4161_v2  ;;  %3848 = vmatpush1.bf16.msra.mxu1 %v4163_v3  ;;  %v4219_v2 = vcombine.low %v298_v53, %v302_v55  ;;  %v4226_v3 = vcombine.high %v305_v61, %v309_v62  ;;  %v358_v53 = vld [vmem:[%s5159_s30 + $0x3f8] sm:$0xff]  ;;  %v365_v61 = vld [vmem:[%s5159_s30 + $0x430] sm:$0xff] }
 0x179   : > { %3685 = vmatprep.subr.bf16.mxu0 %v4170_v4  ;;  %3849 = vmatprep.subr.bf16.mxu1 %v4172_v5  ;;  %v4228_v4 = vcombine.high %v306_v63, %v310_v0  ;;  %v313_v5 = vld [vmem:[%s5159_s30 + $0x290] sm:$0xff]  ;;  %v362_v62 = vld [vmem:[%s5159_s30 + $0x418] sm:$0xff] }
 0x17a   : > { %v4233_v18 = vcombine.low %v313_v5, %v317_v6 }
 0x17c   : > { %3686 = vmatpush1.bf16.msra.mxu0 %v4169_v10  ;;  %3850 = vmatpush1.bf16.msra.mxu1 %v4171_v11  ;;  %v4227_v10 = vcombine.low %v306_v63, %v310_v0  ;;  %v4234_v11 = vcombine.high %v313_v5, %v317_v6  ;;  %v366_v63 = vld [vmem:[%s5159_s30 + $0x438] sm:$0xff]  ;;  %v373_v5 = vld [vmem:[%s5159_s30 + $0x470] sm:$0xff] }
 0x17d   : > { %3687 = vmatprep.subr.bf16.mxu0 %v4178_v13  ;;  %3851 = vmatprep.subr.bf16.mxu1 %v4180_v14  ;;  %v4236_v13 = vcombine.high %v314_v7, %v318_v8  ;;  %v321_v14 = vld [vmem:[%s5159_s30 + $0x2d0] sm:$0xff]  ;;  %v370_v6 = vld [vmem:[%s5159_s30 + $0x458] sm:$0xff] }
 0x17e   : > { %v4241_v27 = vcombine.low %v321_v14, %v325_v15 }
 0x180   : > { %3688 = vmatpush1.bf16.msra.mxu0 %v4177_v19  ;;  %3852 = vmatpush1.bf16.msra.mxu1 %v4179_v57  ;;  %v4235_v19 = vcombine.low %v314_v7, %v318_v8  ;;  %v4242_v57 = vcombine.high %v321_v14, %v325_v15  ;;  %v374_v7 = vld [vmem:[%s5159_s30 + $0x478] sm:$0xff]  ;;  %v381_v14 = vld [vmem:[%s5159_s30 + $0x4b0] sm:$0xff] }
 0x181   : > { %3689 = vmatprep.subr.bf16.mxu0 %v4186_v20  ;;  %3853 = vmatprep.subr.bf16.mxu1 %v4188_v23  ;;  %v4244_v20 = vcombine.high %v322_v16, %v326_v17  ;;  %v329_v23 = vld [vmem:[%s5159_s30 + $0x310] sm:$0xff]  ;;  %v378_v15 = vld [vmem:[%s5159_s30 + $0x498] sm:$0xff] }
 0x182   : > { %v4249_v37 = vcombine.low %v329_v23, %v333_v24 }
 0x184   : > { %3690 = vmatpush1.bf16.msra.mxu0 %v4185_v28  ;;  %3854 = vmatpush1.bf16.msra.mxu1 %v4187_v29  ;;  %v4243_v28 = vcombine.low %v322_v16, %v326_v17  ;;  %v4250_v29 = vcombine.high %v329_v23, %v333_v24  ;;  %v382_v16 = vld [vmem:[%s5159_s30 + $0x4b8] sm:$0xff]  ;;  %v389_v23 = vld [vmem:[%s5159_s30 + $0x4f0] sm:$0xff] }
 0x185   : > { %3691 = vmatprep.subr.bf16.mxu0 %v4194_v30  ;;  %3855 = vmatprep.subr.bf16.mxu1 %v4196_v31  ;;  %v4252_v30 = vcombine.high %v330_v25, %v334_v26  ;;  %v337_v31 = vld [vmem:[%s5159_s30 + $0x350] sm:$0xff]  ;;  %v386_v24 = vld [vmem:[%s5159_s30 + $0x4d8] sm:$0xff] }
 0x186   : > { %v4257_v45 = vcombine.low %v337_v31, %v341_v33 }
 0x188   : > { %3692 = vmatpush1.bf16.msra.mxu0 %v4193_v38  ;;  %3856 = vmatpush1.bf16.msra.mxu1 %v4195_v39  ;;  %v4251_v38 = vcombine.low %v330_v25, %v334_v26  ;;  %v4258_v39 = vcombine.high %v337_v31, %v341_v33  ;;  %v390_v25 = vld [vmem:[%s5159_s30 + $0x4f8] sm:$0xff]  ;;  %v4299_v26 = vcombine.low %v378_v15, %v382_v16 }
 0x189   : > { %3693 = vmatprep.subr.bf16.mxu0 %v4202_v40  ;;  %3857 = vmatprep.subr.bf16.mxu1 %v4204_v41  ;;  %v4260_v40 = vcombine.high %v338_v34, %v342_v35  ;;  %v345_v41 = vld [vmem:[%s5159_s30 + $0x390] sm:$0xff]  ;;  %v394_v31 = vld [vmem:[%s5159_s30 + $0x518] sm:$0xff] }
 0x18a   : > { %v4265_v55 = vcombine.low %v345_v41, %v349_v42  ;;  %v398_v33 = vld [vmem:[%s5159_s30 + $0x538] sm:$0xff] }
 0x18c   : > { %3694 = vmatpush1.bf16.msra.mxu0 %v4201_v47  ;;  %3858 = vmatpush1.bf16.msra.mxu1 %v4203_v48  ;;  %v4259_v47 = vcombine.low %v338_v34, %v342_v35  ;;  %v4266_v48 = vcombine.high %v345_v41, %v349_v42  ;;  %v406_v41 = vld [vmem:[%s5159_s30 + $0x578] sm:$0xff] }
 0x18d   : > { %3695 = vmatprep.subr.bf16.mxu0 %v4210_v49  ;;  %3859 = vmatprep.subr.bf16.mxu1 %v4212_v50  ;;  %v4268_v49 = vcombine.high %v346_v43, %v350_v44  ;;  %v353_v50 = vld [vmem:[%s5159_s30 + $0x3d0] sm:$0xff] }
 0x18e   : > { %v4273_v0 = vcombine.low %v353_v50, %v357_v51 }
 0x190   : > { %3696 = vmatpush1.bf16.msra.mxu0 %v4209_v56  ;;  %3860 = vmatpush1.bf16.msra.mxu1 %v4211_v58  ;;  %v4267_v56 = vcombine.low %v346_v43, %v350_v44  ;;  %v4274_v58 = vcombine.high %v353_v50, %v357_v51  ;;  %v4315_v43 = vcombine.low %v394_v31, %v398_v33  ;;  %v414_v50 = vld [vmem:[%s5159_s30 + $0x5b8] sm:$0xff] }
 0x191   : > { %3697 = vmatprep.subr.bf16.mxu0 %v4218_v59  ;;  %3861 = vmatprep.subr.bf16.mxu1 %v4220_v60  ;;  %v4276_v59 = vcombine.high %v354_v52, %v358_v53  ;;  %v361_v60 = vld [vmem:[%s5159_s30 + $0x410] sm:$0xff] }
 0x192   : > { %v4281_v8 = vcombine.low %v361_v60, %v365_v61 }
 0x194   : > { %3698 = vmatpush1.bf16.msra.mxu0 %v4217_v1  ;;  %3862 = vmatpush1.bf16.msra.mxu1 %v4219_v2  ;;  %v4275_v1 = vcombine.low %v354_v52, %v358_v53  ;;  %v4282_v2 = vcombine.high %v361_v60, %v365_v61  ;;  %v422_v60 = vld [vmem:[%s5159_s30 + $0x5f8] sm:$0xff] }
 0x195   : > { %3699 = vmatprep.subr.bf16.mxu0 %v4226_v3  ;;  %3863 = vmatprep.subr.bf16.mxu1 %v4228_v4  ;;  %v4284_v3 = vcombine.high %v362_v62, %v366_v63  ;;  %v369_v4 = vld [vmem:[%s5159_s30 + $0x450] sm:$0xff] }
 0x196   : > { %v4289_v17 = vcombine.low %v369_v4, %v373_v5 }
 0x198   : > { %3700 = vmatpush1.bf16.msra.mxu0 %v4225_v9  ;;  %3864 = vmatpush1.bf16.msra.mxu1 %v4227_v10  ;;  %v4283_v9 = vcombine.low %v362_v62, %v366_v63  ;;  %v4290_v10 = vcombine.high %v369_v4, %v373_v5  ;;  %v430_v4 = vld [vmem:[%s5159_s30 + $0x638] sm:$0xff] }
 0x199   : > { %3701 = vmatprep.subr.bf16.mxu0 %v4234_v11  ;;  %3865 = vmatprep.subr.bf16.mxu1 %v4236_v13  ;;  %v4292_v11 = vcombine.high %v370_v6, %v374_v7  ;;  %v377_v13 = vld [vmem:[%s5159_s30 + $0x490] sm:$0xff] }
 0x19c   : > { %3702 = vmatpush1.bf16.msra.mxu0 %v4233_v18  ;;  %3866 = vmatpush1.bf16.msra.mxu1 %v4235_v19  ;;  %v4291_v18 = vcombine.low %v370_v6, %v374_v7  ;;  %v4298_v19 = vcombine.high %v377_v13, %v381_v14 }
 0x19d   : > { %3703 = vmatprep.subr.bf16.mxu0 %v4242_v57  ;;  %3867 = vmatprep.subr.bf16.mxu1 %v4244_v20  ;;  %v4300_v57 = vcombine.high %v378_v15, %v382_v16  ;;  %v385_v20 = vld [vmem:[%s5159_s30 + $0x4d0] sm:$0xff] }
 0x19e   : > { %v4305_v34 = vcombine.low %v385_v20, %v389_v23 }
 0x1a0   : > { %3704 = vmatpush1.bf16.msra.mxu0 %v4241_v27  ;;  %3868 = vmatpush1.bf16.msra.mxu1 %v4243_v28  ;;  %v4306_v27 = vcombine.high %v385_v20, %v389_v23  ;;  %v4308_v28 = vcombine.high %v386_v24, %v390_v25  ;;  %v446_v20 = vld [vmem:[%s5159_s30 + $0x6b8] sm:$0xff] }
 0x1a1   : > { %3705 = vmatprep.subr.bf16.mxu0 %v4250_v29  ;;  %3869 = vmatprep.subr.bf16.mxu1 %v4252_v30  ;;  %v393_v29 = vld [vmem:[%s5159_s30 + $0x510] sm:$0xff] }
 0x1a2   : > { %v397_v30 = vld [vmem:[%s5159_s30 + $0x530] sm:$0xff] }
 0x1a3   : > { %v4314_v35 = vcombine.high %v393_v29, %v397_v30  ;;  %v4313_v42 = vcombine.low %v393_v29, %v397_v30  ;;  %v454_v29 = vld [vmem:[%s5159_s30 + $0x6f8] sm:$0xff] }
 0x1a4   : > { %3706 = vmatpush1.bf16.msra.mxu0 %v4249_v37  ;;  %3870 = vmatpush1.bf16.msra.mxu1 %v4251_v38  ;;  %v4316_v37 = vcombine.high %v394_v31, %v398_v33  ;;  %v401_v38 = vld [vmem:[%s5159_s30 + $0x550] sm:$0xff] }
 0x1a5   : > { %3707 = vmatprep.subr.bf16.mxu0 %v4258_v39  ;;  %3871 = vmatprep.subr.bf16.mxu1 %v4260_v40  ;;  %v405_v39 = vld [vmem:[%s5159_s30 + $0x570] sm:$0xff]  ;;  %v402_v40 = vld [vmem:[%s5159_s30 + $0x558] sm:$0xff] }
 0x1a6   : > { %v4322_v44 = vcombine.high %v401_v38, %v405_v39  ;;  %v4321_v51 = vcombine.low %v401_v38, %v405_v39  ;;  %v4323_v52 = vcombine.low %v402_v40, %v406_v41  ;;  %v462_v38 = vld [vmem:[%s5159_s30 + $0x738] sm:$0xff] }
 0x1a8   : > { %3708 = vmatpush1.bf16.msra.mxu0 %v4257_v45  ;;  %3872 = vmatpush1.bf16.msra.mxu1 %v4259_v47  ;;  %v4324_v45 = vcombine.high %v402_v40, %v406_v41  ;;  %v409_v47 = vld [vmem:[%s5159_s30 + $0x590] sm:$0xff] }
 0x1a9   : > { %3709 = vmatprep.subr.bf16.mxu0 %v4266_v48  ;;  %3873 = vmatprep.subr.bf16.mxu1 %v4268_v49  ;;  %v413_v48 = vld [vmem:[%s5159_s30 + $0x5b0] sm:$0xff]  ;;  %v410_v49 = vld [vmem:[%s5159_s30 + $0x598] sm:$0xff] }
 0x1aa   : > { %v4330_v53 = vcombine.high %v409_v47, %v413_v48  ;;  %v4329_v61 = vcombine.low %v409_v47, %v413_v48  ;;  %v4331_v62 = vcombine.low %v410_v49, %v414_v50  ;;  %v470_v47 = vld [vmem:[%s5159_s30 + $0x778] sm:$0xff] }
 0x1ac   : > { %3710 = vmatpush1.bf16.msra.mxu0 %v4265_v55  ;;  %3874 = vmatpush1.bf16.msra.mxu1 %v4267_v56  ;;  %v4332_v55 = vcombine.high %v410_v49, %v414_v50  ;;  %v417_v56 = vld [vmem:[%s5159_s30 + $0x5d0] sm:$0xff] }
 0x1ad   : > { %3711 = vmatprep.subr.bf16.mxu0 %v4274_v58  ;;  %3875 = vmatprep.subr.bf16.mxu1 %v4276_v59  ;;  %v421_v58 = vld [vmem:[%s5159_s30 + $0x5f0] sm:$0xff]  ;;  %v418_v59 = vld [vmem:[%s5159_s30 + $0x5d8] sm:$0xff] }
 0x1ae   : > { %v4338_v63 = vcombine.high %v417_v56, %v421_v58  ;;  %v4337_v5 = vcombine.low %v417_v56, %v421_v58  ;;  %v4339_v6 = vcombine.low %v418_v59, %v422_v60  ;;  %v478_v56 = vld [vmem:[%s5159_s30 + $0x7b8] sm:$0xff] }
 0x1b0   : > { %3712 = vmatpush1.bf16.msra.mxu0 %v4273_v0  ;;  %3876 = vmatpush1.bf16.msra.mxu1 %v4275_v1  ;;  %v4340_v0 = vcombine.high %v418_v59, %v422_v60  ;;  %v425_v1 = vld [vmem:[%s5159_s30 + $0x610] sm:$0xff] }
 0x1b1   : > { %3722 = vmatprep.subr.bf16.mxu0 %v4282_v2  ;;  %3886 = vmatprep.subr.bf16.mxu1 %v4284_v3  ;;  %v429_v2 = vld [vmem:[%s5159_s30 + $0x630] sm:$0xff]  ;;  %v426_v3 = vld [vmem:[%s5159_s30 + $0x618] sm:$0xff] }
 0x1b2   : > { %v4346_v7 = vcombine.high %v425_v1, %v429_v2  ;;  %v4347_v15 = vcombine.low %v426_v3, %v430_v4 }
 0x1b3   : > { %3714 = vmatmul.mubr.bf16.vlgmr.msra.gmra.mrb[4].mxu0 %v5243_v12  ;;  %3878 = vmatmul.mubr.bf16.vlgmr.msra.gmra.mrb[4].mxu1 %v5243_v12  ;;  %v4297_v12 = vcombine.low %v377_v13, %v381_v14  ;;  %v438_v13 = vld [vmem:[%s5159_s30 + $0x678] sm:$0xff]  ;;  %v4345_v14 = vcombine.low %v425_v1, %v429_v2 }
 0x1b4   : > { %3723 = vmatpush1.bf16.msra.mxu0 %v4281_v8  ;;  %3887 = vmatpush1.bf16.msra.mxu1 %v4283_v9  ;;  %v4348_v8 = vcombine.high %v426_v3, %v430_v4  ;;  %v433_v9 = vld [vmem:[%s5159_s30 + $0x650] sm:$0xff]  ;;  %v486_v1 = vld [vmem:[%s5159_s30 + $0x7f8] sm:$0xff] }
 0x1b5   : > { %3724 = vmatprep.subr.bf16.mxu0 %v4290_v10  ;;  %3888 = vmatprep.subr.bf16.mxu1 %v4292_v11  ;;  %v437_v10 = vld [vmem:[%s5159_s30 + $0x670] sm:$0xff]  ;;  %v434_v11 = vld [vmem:[%s5159_s30 + $0x658] sm:$0xff] }
 0x1b6   : > { %3754 = vmatprep.mubr.bf16.mxu0 %v5249_v22  ;;  %3918 = vmatprep.mubr.bf16.mxu1 %v5249_v22  ;;  %v4307_v22 = vcombine.low %v386_v24, %v390_v25  ;;  %v4354_v16 = vcombine.high %v433_v9, %v437_v10  ;;  %v4353_v23 = vcombine.low %v433_v9, %v437_v10  ;;  %v494_v9 = vld [vmem:[%s5159_s30 + $0x838] sm:$0xff] }
 0x1b7   : > { %v4355_v24 = vcombine.low %v434_v11, %v438_v13 }
 0x1b8   : > { %3725 = vmatpush1.bf16.msra.mxu0 %v4289_v17  ;;  %3889 = vmatpush1.bf16.msra.mxu1 %v4291_v18  ;;  %v4356_v17 = vcombine.high %v434_v11, %v438_v13  ;;  %v441_v18 = vld [vmem:[%s5159_s30 + $0x690] sm:$0xff] }
 0x1b9   : > { %3726 = vmatprep.subr.bf16.mxu0 %v4298_v19  ;;  %3890 = vmatprep.subr.bf16.mxu1 %v4300_v57  ;;  %v445_v19 = vld [vmem:[%s5159_s30 + $0x6b0] sm:$0xff]  ;;  %v442_v57 = vld [vmem:[%s5159_s30 + $0x698] sm:$0xff] }
 0x1ba   : > { %v4362_v25 = vcombine.high %v441_v18, %v445_v19  ;;  %v4361_v30 = vcombine.low %v441_v18, %v445_v19  ;;  %v4363_v31 = vcombine.low %v442_v57, %v446_v20  ;;  %v502_v18 = vld [vmem:[%s5159_s30 + $0x878] sm:$0xff] }
 0x1bc   : > { %3727 = vmatpush1.bf16.msra.mxu0 %v4297_v12  ;;  %3891 = vmatpush1.bf16.msra.mxu1 %v4299_v26  ;;  %v4364_v12 = vcombine.high %v442_v57, %v446_v20  ;;  %v449_v26 = vld [vmem:[%s5159_s30 + $0x6d0] sm:$0xff] }
 0x1bd   : > { %3728 = vmatprep.subr.bf16.mxu0 %v4306_v27  ;;  %3892 = vmatprep.subr.bf16.mxu1 %v4308_v28  ;;  %v453_v27 = vld [vmem:[%s5159_s30 + $0x6f0] sm:$0xff]  ;;  %v450_v28 = vld [vmem:[%s5159_s30 + $0x6d8] sm:$0xff] }
 0x1be   : > { %v4370_v33 = vcombine.high %v449_v26, %v453_v27  ;;  %v4369_v39 = vcombine.low %v449_v26, %v453_v27  ;;  %v4371_v40 = vcombine.low %v450_v28, %v454_v29  ;;  %v510_v26 = vld [vmem:[%s5159_s30 + $0x8b8] sm:$0xff] }
 0x1c0   : > { %3729 = vmatpush1.bf16.msra.mxu0 %v4305_v34  ;;  %3893 = vmatpush1.bf16.msra.mxu1 %v4307_v22  ;;  %v4372_v34 = vcombine.high %v450_v28, %v454_v29  ;;  %v457_v22 = vld [vmem:[%s5159_s30 + $0x710] sm:$0xff] }
 0x1c1   : > { %3730 = vmatprep.subr.bf16.mxu0 %v4314_v35  ;;  %3894 = vmatprep.subr.bf16.mxu1 %v4316_v37  ;;  %v461_v35 = vld [vmem:[%s5159_s30 + $0x730] sm:$0xff]  ;;  %v458_v37 = vld [vmem:[%s5159_s30 + $0x718] sm:$0xff] }
 0x1c2   : > { %v4378_v41 = vcombine.high %v457_v22, %v461_v35  ;;  %v4377_v48 = vcombine.low %v457_v22, %v461_v35  ;;  %v4379_v49 = vcombine.low %v458_v37, %v462_v38  ;;  %v518_v22 = vld [vmem:[%s5159_s30 + $0x8f8] sm:$0xff] }
 0x1c4   : > { %3731 = vmatpush1.bf16.msra.mxu0 %v4313_v42  ;;  %3895 = vmatpush1.bf16.msra.mxu1 %v4315_v43  ;;  %v4380_v42 = vcombine.high %v458_v37, %v462_v38  ;;  %v465_v43 = vld [vmem:[%s5159_s30 + $0x750] sm:$0xff] }
 0x1c5   : > { %3732 = vmatprep.subr.bf16.mxu0 %v4322_v44  ;;  %3896 = vmatprep.subr.bf16.mxu1 %v4324_v45  ;;  %v469_v44 = vld [vmem:[%s5159_s30 + $0x770] sm:$0xff]  ;;  %v466_v45 = vld [vmem:[%s5159_s30 + $0x758] sm:$0xff] }
 0x1c6   : > { %v4386_v50 = vcombine.high %v465_v43, %v469_v44  ;;  %v4385_v58 = vcombine.low %v465_v43, %v469_v44  ;;  %v4387_v59 = vcombine.low %v466_v45, %v470_v47 }
 0x1c8   : > { %3733 = vmatpush1.bf16.msra.mxu0 %v4321_v51  ;;  %3897 = vmatpush1.bf16.msra.mxu1 %v4323_v52  ;;  %v4388_v51 = vcombine.high %v466_v45, %v470_v47  ;;  %v473_v52 = vld [vmem:[%s5159_s30 + $0x790] sm:$0xff] }
 0x1c9   : > { %3734 = vmatprep.subr.bf16.mxu0 %v4330_v53  ;;  %3898 = vmatprep.subr.bf16.mxu1 %v4332_v55  ;;  %v477_v53 = vld [vmem:[%s5159_s30 + $0x7b0] sm:$0xff]  ;;  %v474_v55 = vld [vmem:[%s5159_s30 + $0x798] sm:$0xff] }
 0x1ca   : > { %v4394_v60 = vcombine.high %v473_v52, %v477_v53  ;;  %v4393_v2 = vcombine.low %v473_v52, %v477_v53  ;;  %v4395_v3 = vcombine.low %v474_v55, %v478_v56  ;;  %v529_v47 = vld [vmem:[%s5159_s30 + $0x950] sm:$0xff] }
 0x1cc   : > { %3735 = vmatpush1.bf16.msra.mxu0 %v4329_v61  ;;  %3899 = vmatpush1.bf16.msra.mxu1 %v4331_v62  ;;  %v4396_v61 = vcombine.high %v474_v55, %v478_v56  ;;  %v481_v62 = vld [vmem:[%s5159_s30 + $0x7d0] sm:$0xff] }
 0x1cd   : > { %3736 = vmatprep.subr.bf16.mxu0 %v4338_v63  ;;  %3900 = vmatprep.subr.bf16.mxu1 %v4340_v0  ;;  %v485_v63 = vld [vmem:[%s5159_s30 + $0x7f0] sm:$0xff]  ;;  %v482_v0 = vld [vmem:[%s5159_s30 + $0x7d8] sm:$0xff] }
 0x1ce   : > { %v4402_v4 = vcombine.high %v481_v62, %v485_v63  ;;  %v4401_v10 = vcombine.low %v481_v62, %v485_v63  ;;  %v4403_v11 = vcombine.low %v482_v0, %v486_v1  ;;  %v537_v56 = vld [vmem:[%s5159_s30 + $0x990] sm:$0xff] }
 0x1d0   : > { %3737 = vmatpush1.bf16.msra.mxu0 %v4337_v5  ;;  %3901 = vmatpush1.bf16.msra.mxu1 %v4339_v6  ;;  %v4404_v5 = vcombine.high %v482_v0, %v486_v1  ;;  %v489_v6 = vld [vmem:[%s5159_s30 + $0x810] sm:$0xff] }
 0x1d1   : > { %3738 = vmatprep.subr.bf16.mxu0 %v4346_v7  ;;  %3902 = vmatprep.subr.bf16.mxu1 %v4348_v8  ;;  %v493_v7 = vld [vmem:[%s5159_s30 + $0x830] sm:$0xff]  ;;  %v490_v8 = vld [vmem:[%s5159_s30 + $0x818] sm:$0xff] }
 0x1d2   : > { %v4410_v13 = vcombine.high %v489_v6, %v493_v7  ;;  %v4409_v19 = vcombine.low %v489_v6, %v493_v7  ;;  %v4411_v57 = vcombine.low %v490_v8, %v494_v9  ;;  %v545_v1 = vld [vmem:[%s5159_s30 + $0x9d0] sm:$0xff] }
 0x1d4   : > { %3739 = vmatpush1.bf16.msra.mxu0 %v4345_v14  ;;  %3903 = vmatpush1.bf16.msra.mxu1 %v4347_v15  ;;  %v4412_v14 = vcombine.high %v490_v8, %v494_v9  ;;  %v497_v15 = vld [vmem:[%s5159_s30 + $0x850] sm:$0xff] }
 0x1d5   : > { %3740 = vmatprep.subr.bf16.mxu0 %v4354_v16  ;;  %3904 = vmatprep.subr.bf16.mxu1 %v4356_v17  ;;  %v501_v16 = vld [vmem:[%s5159_s30 + $0x870] sm:$0xff]  ;;  %v498_v17 = vld [vmem:[%s5159_s30 + $0x858] sm:$0xff] }
 0x1d6   : > { %v4418_v20 = vcombine.high %v497_v15, %v501_v16  ;;  %v4417_v27 = vcombine.low %v497_v15, %v501_v16  ;;  %v4419_v28 = vcombine.low %v498_v17, %v502_v18  ;;  %v553_v9 = vld [vmem:[%s5159_s30 + $0xa10] sm:$0xff] }
 0x1d8   : > { %3741 = vmatpush1.bf16.msra.mxu0 %v4353_v23  ;;  %3905 = vmatpush1.bf16.msra.mxu1 %v4355_v24  ;;  %v4420_v23 = vcombine.high %v498_v17, %v502_v18  ;;  %v505_v24 = vld [vmem:[%s5159_s30 + $0x890] sm:$0xff] }
 0x1d9   : > { %3742 = vmatprep.subr.bf16.mxu0 %v4362_v25  ;;  %3906 = vmatprep.subr.bf16.mxu1 %v4364_v12  ;;  %v509_v25 = vld [vmem:[%s5159_s30 + $0x8b0] sm:$0xff]  ;;  %v506_v12 = vld [vmem:[%s5159_s30 + $0x898] sm:$0xff] }
 0x1da   : > { %v4426_v29 = vcombine.high %v505_v24, %v509_v25  ;;  %v4427_v35 = vcombine.low %v506_v12, %v510_v26  ;;  %v561_v18 = vld [vmem:[%s5159_s30 + $0xa50] sm:$0xff] }
 0x1dc   : > { %3743 = vmatpush1.bf16.msra.mxu0 %v4361_v30  ;;  %3907 = vmatpush1.bf16.msra.mxu1 %v4363_v31  ;;  %v4428_v30 = vcombine.high %v506_v12, %v510_v26  ;;  %v513_v31 = vld [vmem:[%s5159_s30 + $0x8d0] sm:$0xff] }
 0x1dd   : > { %3744 = vmatprep.subr.bf16.mxu0 %v4370_v33  ;;  %3908 = vmatprep.subr.bf16.mxu1 %v4372_v34  ;;  %v517_v33 = vld [vmem:[%s5159_s30 + $0x8f0] sm:$0xff]  ;;  %v514_v34 = vld [vmem:[%s5159_s30 + $0x8d8] sm:$0xff] }
 0x1de   : > { %v4434_v37 = vcombine.high %v513_v31, %v517_v33  ;;  %v4436_v38 = vcombine.high %v514_v34, %v518_v22  ;;  %v4433_v43 = vcombine.low %v513_v31, %v517_v33  ;;  %v569_v26 = vld [vmem:[%s5159_s30 + $0xa90] sm:$0xff] }
 0x1e0   : > { %3745 = vmatpush1.bf16.msra.mxu0 %v4369_v39  ;;  %3909 = vmatpush1.bf16.msra.mxu1 %v4371_v40  ;;  %v521_v39 = vld [vmem:[%s5159_s30 + $0x910] sm:$0xff] }
 0x1e1   : > { %3746 = vmatprep.subr.bf16.mxu0 %v4378_v41  ;;  %3910 = vmatprep.subr.bf16.mxu1 %v4380_v42  ;;  %v525_v40 = vld [vmem:[%s5159_s30 + $0x930] sm:$0xff]  ;;  %v522_v41 = vld [vmem:[%s5159_s30 + $0x918] sm:$0xff] }
 0x1e2   : > { %v526_v42 = vld [vmem:[%s5159_s30 + $0x938] sm:$0xff]  ;;  %v4442_v44 = vcombine.high %v521_v39, %v525_v40 }
 0x1e3   : > { %v4444_v45 = vcombine.high %v522_v41, %v526_v42  ;;  %v4443_v52 = vcombine.low %v522_v41, %v526_v42  ;;  %v585_v42 = vld [vmem:[%s5159_s30 + $0xb10] sm:$0xff] }
 0x1e4   : > { %3747 = vmatpush1.bf16.msra.mxu0 %v4377_v48  ;;  %3911 = vmatpush1.bf16.msra.mxu1 %v4379_v49  ;;  %v533_v48 = vld [vmem:[%s5159_s30 + $0x970] sm:$0xff]  ;;  %v530_v49 = vld [vmem:[%s5159_s30 + $0x958] sm:$0xff] }
 0x1e5   : > { %3748 = vmatprep.subr.bf16.mxu0 %v4386_v50  ;;  %3912 = vmatprep.subr.bf16.mxu1 %v4388_v51  ;;  %v534_v50 = vld [vmem:[%s5159_s30 + $0x978] sm:$0xff]  ;;  %v4441_v51 = vcombine.low %v521_v39, %v525_v40  ;;  %v4450_v53 = vcombine.high %v529_v47, %v533_v48 }
 0x1e6   : > { %v4452_v55 = vcombine.high %v530_v49, %v534_v50  ;;  %v4451_v62 = vcombine.low %v530_v49, %v534_v50  ;;  %v593_v50 = vld [vmem:[%s5159_s30 + $0xb50] sm:$0xff] }
 0x1e8   : > { %3749 = vmatpush1.bf16.msra.mxu0 %v4385_v58  ;;  %3913 = vmatpush1.bf16.msra.mxu1 %v4387_v59  ;;  %v541_v58 = vld [vmem:[%s5159_s30 + $0x9b0] sm:$0xff]  ;;  %v538_v59 = vld [vmem:[%s5159_s30 + $0x998] sm:$0xff] }
 0x1e9   : > { %3750 = vmatprep.subr.bf16.mxu0 %v4394_v60  ;;  %3914 = vmatprep.subr.bf16.mxu1 %v4396_v61  ;;  %v542_v60 = vld [vmem:[%s5159_s30 + $0x9b8] sm:$0xff]  ;;  %v4449_v61 = vcombine.low %v529_v47, %v533_v48  ;;  %v4458_v63 = vcombine.high %v537_v56, %v541_v58 }
 0x1ea   : > { %v4460_v0 = vcombine.high %v538_v59, %v542_v60  ;;  %v4459_v6 = vcombine.low %v538_v59, %v542_v60  ;;  %v601_v60 = vld [vmem:[%s5159_s30 + $0xb90] sm:$0xff] }
 0x1ec   : > { %3751 = vmatpush1.bf16.msra.mxu0 %v4393_v2  ;;  %3915 = vmatpush1.bf16.msra.mxu1 %v4395_v3  ;;  %v549_v2 = vld [vmem:[%s5159_s30 + $0x9f0] sm:$0xff]  ;;  %v546_v3 = vld [vmem:[%s5159_s30 + $0x9d8] sm:$0xff] }
 0x1ed   : > { %3752 = vmatprep.subr.bf16.mxu0 %v4402_v4  ;;  %3916 = vmatprep.subr.bf16.mxu1 %v4404_v5  ;;  %v550_v4 = vld [vmem:[%s5159_s30 + $0x9f8] sm:$0xff]  ;;  %v4457_v5 = vcombine.low %v537_v56, %v541_v58  ;;  %v4466_v7 = vcombine.high %v545_v1, %v549_v2 }
 0x1ee   : > { %v4468_v8 = vcombine.high %v546_v3, %v550_v4  ;;  %v4467_v15 = vcombine.low %v546_v3, %v550_v4  ;;  %v609_v4 = vld [vmem:[%s5159_s30 + $0xbd0] sm:$0xff] }
 0x1f0   : > { %3753 = vmatpush1.bf16.msra.mxu0 %v4401_v10  ;;  %3917 = vmatpush1.bf16.msra.mxu1 %v4403_v11  ;;  %v557_v10 = vld [vmem:[%s5159_s30 + $0xa30] sm:$0xff]  ;;  %v554_v11 = vld [vmem:[%s5159_s30 + $0xa18] sm:$0xff] }
 0x1f1   : > { %3763 = vmatprep.subr.bf16.mxu0 %v4410_v13  ;;  %3927 = vmatprep.subr.bf16.mxu1 %v4412_v14  ;;  %v558_v13 = vld [vmem:[%s5159_s30 + $0xa38] sm:$0xff]  ;;  %v4465_v14 = vcombine.low %v545_v1, %v549_v2  ;;  %v4474_v16 = vcombine.high %v553_v9, %v557_v10 }
 0x1f2   : > { %v4476_v17 = vcombine.high %v554_v11, %v558_v13 }
 0x1f3   : > { %3755 = vmatmul.mubr.bf16.vlgmr.msra.gmra.mrb[4].mxu0 %v5315_v21  ;;  %3919 = vmatmul.mubr.bf16.vlgmr.msra.gmra.mrb[4].mxu1 %v5315_v21  ;;  %v4425_v21 = vcombine.low %v505_v24, %v509_v25  ;;  %v4475_v24 = vcombine.low %v554_v11, %v558_v13  ;;  %v617_v13 = vld [vmem:[%s5159_s30 + $0xc10] sm:$0xff] }
 0x1f4   : > { %3764 = vmatpush1.bf16.msra.mxu0 %v4409_v19  ;;  %3928 = vmatpush1.bf16.msra.mxu1 %v4411_v57  ;;  %v565_v19 = vld [vmem:[%s5159_s30 + $0xa70] sm:$0xff]  ;;  %v562_v57 = vld [vmem:[%s5159_s30 + $0xa58] sm:$0xff] }
 0x1f5   : > { %3765 = vmatprep.subr.bf16.mxu0 %v4418_v20  ;;  %3929 = vmatprep.subr.bf16.mxu1 %v4420_v23  ;;  %v566_v20 = vld [vmem:[%s5159_s30 + $0xa78] sm:$0xff]  ;;  %v4473_v23 = vcombine.low %v553_v9, %v557_v10  ;;  %v4482_v25 = vcombine.high %v561_v18, %v565_v19 }
 0x1f6   : > { %3795 = vmatprep.mubr.bf16.mxu0 %v5321_v32  ;;  %3959 = vmatprep.mubr.bf16.mxu1 %v5321_v32  ;;  %v4435_v32 = vcombine.low %v514_v34, %v518_v22  ;;  %v4484_v12 = vcombine.high %v562_v57, %v566_v20  ;;  %v4483_v31 = vcombine.low %v562_v57, %v566_v20  ;;  %v577_v22 = vld [vmem:[%s5159_s30 + $0xad0] sm:$0xff] }
 0x1f7   : > { %v625_v20 = vld [vmem:[%s5159_s30 + $0xc50] sm:$0xff] }
 0x1f8   : > { %3766 = vmatpush1.bf16.msra.mxu0 %v4417_v27  ;;  %3930 = vmatpush1.bf16.msra.mxu1 %v4419_v28  ;;  %v573_v27 = vld [vmem:[%s5159_s30 + $0xab0] sm:$0xff]  ;;  %v570_v28 = vld [vmem:[%s5159_s30 + $0xa98] sm:$0xff] }
 0x1f9   : > { %3767 = vmatprep.subr.bf16.mxu0 %v4426_v29  ;;  %3931 = vmatprep.subr.bf16.mxu1 %v4428_v30  ;;  %v574_v29 = vld [vmem:[%s5159_s30 + $0xab8] sm:$0xff]  ;;  %v4481_v30 = vcombine.low %v561_v18, %v565_v19  ;;  %v4490_v33 = vcombine.high %v569_v26, %v573_v27 }
 0x1fa   : > { %v4492_v34 = vcombine.high %v570_v28, %v574_v29  ;;  %v4491_v39 = vcombine.low %v570_v28, %v574_v29  ;;  %v633_v29 = vld [vmem:[%s5159_s30 + $0xc90] sm:$0xff] }
 0x1fc   : > { %3768 = vmatpush1.bf16.msra.mxu0 %v4425_v21  ;;  %3932 = vmatpush1.bf16.msra.mxu1 %v4427_v35  ;;  %v581_v21 = vld [vmem:[%s5159_s30 + $0xaf0] sm:$0xff]  ;;  %v578_v35 = vld [vmem:[%s5159_s30 + $0xad8] sm:$0xff] }
 0x1fd   : > { %3769 = vmatprep.subr.bf16.mxu0 %v4434_v37  ;;  %3933 = vmatprep.subr.bf16.mxu1 %v4436_v38  ;;  %v582_v37 = vld [vmem:[%s5159_s30 + $0xaf8] sm:$0xff]  ;;  %v4489_v38 = vcombine.low %v569_v26, %v573_v27  ;;  %v4498_v40 = vcombine.high %v577_v22, %v581_v21 }
 0x1fe   : > { %v4500_v41 = vcombine.high %v578_v35, %v582_v37  ;;  %v4499_v47 = vcombine.low %v578_v35, %v582_v37  ;;  %v641_v37 = vld [vmem:[%s5159_s30 + $0xcd0] sm:$0xff] }
 0x200   : > { %3770 = vmatpush1.bf16.msra.mxu0 %v4433_v43  ;;  %3934 = vmatpush1.bf16.msra.mxu1 %v4435_v32  ;;  %v589_v43 = vld [vmem:[%s5159_s30 + $0xb30] sm:$0xff]  ;;  %v586_v32 = vld [vmem:[%s5159_s30 + $0xb18] sm:$0xff] }
 0x201   : > { %3771 = vmatprep.subr.bf16.mxu0 %v4442_v44  ;;  %3935 = vmatprep.subr.bf16.mxu1 %v4444_v45  ;;  %v590_v44 = vld [vmem:[%s5159_s30 + $0xb38] sm:$0xff]  ;;  %v4497_v45 = vcombine.low %v577_v22, %v581_v21  ;;  %v4506_v48 = vcombine.high %v585_v42, %v589_v43 }
 0x202   : > { %v4508_v49 = vcombine.high %v586_v32, %v590_v44  ;;  %v4507_v56 = vcombine.low %v586_v32, %v590_v44  ;;  %v649_v44 = vld [vmem:[%s5159_s30 + $0xd10] sm:$0xff] }
 0x204   : > { %3772 = vmatpush1.bf16.msra.mxu0 %v4441_v51  ;;  %3936 = vmatpush1.bf16.msra.mxu1 %v4443_v52  ;;  %v597_v51 = vld [vmem:[%s5159_s30 + $0xb70] sm:$0xff]  ;;  %v594_v52 = vld [vmem:[%s5159_s30 + $0xb58] sm:$0xff] }
 0x205   : > { %3773 = vmatprep.subr.bf16.mxu0 %v4450_v53  ;;  %3937 = vmatprep.subr.bf16.mxu1 %v4452_v55  ;;  %v598_v53 = vld [vmem:[%s5159_s30 + $0xb78] sm:$0xff]  ;;  %v4505_v55 = vcombine.low %v585_v42, %v589_v43  ;;  %v4514_v58 = vcombine.high %v593_v50, %v597_v51 }
 0x206   : > { %v4516_v59 = vcombine.high %v594_v52, %v598_v53  ;;  %v4515_v1 = vcombine.low %v594_v52, %v598_v53  ;;  %v657_v53 = vld [vmem:[%s5159_s30 + $0xd50] sm:$0xff] }
 0x208   : > { %3774 = vmatpush1.bf16.msra.mxu0 %v4449_v61  ;;  %3938 = vmatpush1.bf16.msra.mxu1 %v4451_v62  ;;  %v605_v61 = vld [vmem:[%s5159_s30 + $0xbb0] sm:$0xff]  ;;  %v602_v62 = vld [vmem:[%s5159_s30 + $0xb98] sm:$0xff] }
 0x209   : > { %3775 = vmatprep.subr.bf16.mxu0 %v4458_v63  ;;  %3939 = vmatprep.subr.bf16.mxu1 %v4460_v0  ;;  %v606_v63 = vld [vmem:[%s5159_s30 + $0xbb8] sm:$0xff]  ;;  %v4513_v0 = vcombine.low %v593_v50, %v597_v51  ;;  %v4522_v2 = vcombine.high %v601_v60, %v605_v61 }
 0x20a   : > { %v4524_v3 = vcombine.high %v602_v62, %v606_v63  ;;  %v4523_v9 = vcombine.low %v602_v62, %v606_v63 }
 0x20c   : > { %3776 = vmatpush1.bf16.msra.mxu0 %v4457_v5  ;;  %3940 = vmatpush1.bf16.msra.mxu1 %v4459_v6  ;;  %v613_v5 = vld [vmem:[%s5159_s30 + $0xbf0] sm:$0xff]  ;;  %v610_v6 = vld [vmem:[%s5159_s30 + $0xbd8] sm:$0xff] }
 0x20d   : > { %3777 = vmatprep.subr.bf16.mxu0 %v4466_v7  ;;  %3941 = vmatprep.subr.bf16.mxu1 %v4468_v8  ;;  %v614_v7 = vld [vmem:[%s5159_s30 + $0xbf8] sm:$0xff]  ;;  %v4521_v8 = vcombine.low %v601_v60, %v605_v61  ;;  %v4530_v10 = vcombine.high %v609_v4, %v613_v5 }
 0x20e   : > { %v4532_v11 = vcombine.high %v610_v6, %v614_v7  ;;  %v4531_v18 = vcombine.low %v610_v6, %v614_v7  ;;  %v5692_v61 = vld [vmem:[%s750_s10] ss:$4 sm:$0xff] }
 0x20f   : > { %v666_v7 = vld [vmem:[%s5159_s30 + $0xd98] sm:$0xff] }
 0x210   : > { %3778 = vmatpush1.bf16.msra.mxu0 %v4465_v14  ;;  %3942 = vmatpush1.bf16.msra.mxu1 %v4467_v15  ;;  %v621_v14 = vld [vmem:[%s5159_s30 + $0xc30] sm:$0xff]  ;;  %v618_v15 = vld [vmem:[%s5159_s30 + $0xc18] sm:$0xff] }
 0x211   : > { %3779 = vmatprep.subr.bf16.mxu0 %v4474_v16  ;;  %3943 = vmatprep.subr.bf16.mxu1 %v4476_v17  ;;  %v622_v16 = vld [vmem:[%s5159_s30 + $0xc38] sm:$0xff]  ;;  %v4529_v17 = vcombine.low %v609_v4, %v613_v5  ;;  %v4538_v19 = vcombine.high %v617_v13, %v621_v14  ;;  %v665_v4 = vld [vmem:[%s5159_s30 + $0xd90] sm:$0xff] }
 0x212   : > { %v4540_v57 = vcombine.high %v618_v15, %v622_v16  ;;  %v4539_v26 = vcombine.low %v618_v15, %v622_v16  ;;  %v669_v5 = vld [vmem:[%s5159_s30 + $0xdb0] sm:$0xff] }
 0x213   : > { %v4586_v15 = vcombine.high %v665_v4, %v669_v5 }
 0x214   : > { %3780 = vmatpush1.bf16.msra.mxu0 %v4473_v23  ;;  %3944 = vmatpush1.bf16.msra.mxu1 %v4475_v24  ;;  %v629_v23 = vld [vmem:[%s5159_s30 + $0xc70] sm:$0xff]  ;;  %v626_v24 = vld [vmem:[%s5159_s30 + $0xc58] sm:$0xff] }
 0x215   : > { %3781 = vmatprep.subr.bf16.mxu0 %v4482_v25  ;;  %3945 = vmatprep.subr.bf16.mxu1 %v4484_v12  ;;  %v630_v25 = vld [vmem:[%s5159_s30 + $0xc78] sm:$0xff]  ;;  %v4537_v12 = vcombine.low %v617_v13, %v621_v14  ;;  %v4546_v27 = vcombine.high %v625_v20, %v629_v23 }
 0x216   : > { %v4548_v28 = vcombine.high %v626_v24, %v630_v25  ;;  %v4547_v22 = vcombine.low %v626_v24, %v630_v25  ;;  %v674_v24 = vld [vmem:[%s5159_s30 + $0xdd8] sm:$0xff] }
 0x217   : > { %v678_v25 = vld [vmem:[%s5159_s30 + $0xdf8] sm:$0xff] }
 0x218   : > { %3782 = vmatpush1.bf16.msra.mxu0 %v4481_v30  ;;  %3946 = vmatpush1.bf16.msra.mxu1 %v4483_v31  ;;  %v637_v30 = vld [vmem:[%s5159_s30 + $0xcb0] sm:$0xff]  ;;  %v634_v31 = vld [vmem:[%s5159_s30 + $0xc98] sm:$0xff] }
 0x219   : > { %3783 = vmatprep.subr.bf16.mxu0 %v4490_v33  ;;  %3947 = vmatprep.subr.bf16.mxu1 %v4492_v34  ;;  %v638_v33 = vld [vmem:[%s5159_s30 + $0xcb8] sm:$0xff]  ;;  %v4545_v34 = vcombine.low %v625_v20, %v629_v23  ;;  %v4554_v21 = vcombine.high %v633_v29, %v637_v30 }
 0x21a   : > { %v4556_v35 = vcombine.high %v634_v31, %v638_v33  ;;  %v4555_v42 = vcombine.low %v634_v31, %v638_v33 }
 0x21c   : > { %3784 = vmatpush1.bf16.msra.mxu0 %v4489_v38  ;;  %3948 = vmatpush1.bf16.msra.mxu1 %v4491_v39  ;;  %v645_v38 = vld [vmem:[%s5159_s30 + $0xcf0] sm:$0xff]  ;;  %v642_v39 = vld [vmem:[%s5159_s30 + $0xcd8] sm:$0xff] }
 0x21d   : > { %3785 = vmatprep.subr.bf16.mxu0 %v4498_v40  ;;  %3949 = vmatprep.subr.bf16.mxu1 %v4500_v41  ;;  %v646_v40 = vld [vmem:[%s5159_s30 + $0xcf8] sm:$0xff]  ;;  %v4553_v41 = vcombine.low %v633_v29, %v637_v30  ;;  %v4562_v43 = vcombine.high %v641_v37, %v645_v38  ;;  %v4585_v29 = vcombine.low %v665_v4, %v669_v5  ;;  %v709_v4 = vld [vmem:[%s5159_s30 + $0xef0] sm:$0xff] }
 0x21e   : > { %v4564_v32 = vcombine.high %v642_v39, %v646_v40  ;;  %v4563_v50 = vcombine.low %v642_v39, %v646_v40  ;;  %v4596_v39 = vcombine.high %v674_v24, %v678_v25  ;;  %v681_v40 = vld [vmem:[%s5159_s30 + $0xe10] sm:$0xff]  ;;  %v706_v5 = vld [vmem:[%s5159_s30 + $0xed8] sm:$0xff] }
 0x220   : > { %3786 = vmatpush1.bf16.msra.mxu0 %v4497_v45  ;;  %3950 = vmatpush1.bf16.msra.mxu1 %v4499_v47  ;;  %v653_v45 = vld [vmem:[%s5159_s30 + $0xd30] sm:$0xff]  ;;  %v650_v47 = vld [vmem:[%s5159_s30 + $0xd18] sm:$0xff] }
 0x221   : > { %3787 = vmatprep.subr.bf16.mxu0 %v4506_v48  ;;  %3951 = vmatprep.subr.bf16.mxu1 %v4508_v49  ;;  %v654_v48 = vld [vmem:[%s5159_s30 + $0xd38] sm:$0xff]  ;;  %v4570_v51 = vcombine.high %v649_v44, %v653_v45  ;;  %v4569_v60 = vcombine.low %v649_v44, %v653_v45  ;;  %v4595_v44 = vcombine.low %v674_v24, %v678_v25 }
 0x222   : > { %v4572_v52 = vcombine.high %v650_v47, %v654_v48  ;;  %v726_v24 = vld [vmem:[%s5159_s30 + $0xf78] sm:$0xff] }
 0x224   : > { %3788 = vmatpush1.bf16.msra.mxu0 %v4505_v55  ;;  %3952 = vmatpush1.bf16.msra.mxu1 %v4507_v56  ;;  %v661_v55 = vld [vmem:[%s5159_s30 + $0xd70] sm:$0xff] }
 0x225   : > { %3789 = vmatprep.subr.bf16.mxu0 %v4514_v58  ;;  %3953 = vmatprep.subr.bf16.mxu1 %v4516_v59  ;;  %v658_v58 = vld [vmem:[%s5159_s30 + $0xd58] sm:$0xff] }
 0x226   : > { %v662_v59 = vld [vmem:[%s5159_s30 + $0xd78] sm:$0xff] }
 0x227   : > { %v4579_v14 = vcombine.low %v658_v58, %v662_v59 }
 0x228   : > { %3790 = vmatpush1.bf16.msra.mxu0 %v4513_v0  ;;  %3954 = vmatpush1.bf16.msra.mxu1 %v4515_v1  ;;  %v4571_v0 = vcombine.low %v650_v47, %v654_v48  ;;  %v689_v48 = vld [vmem:[%s5159_s30 + $0xe50] sm:$0xff] }
 0x229   : > { %3791 = vmatprep.subr.bf16.mxu0 %v4522_v2  ;;  %3955 = vmatprep.subr.bf16.mxu1 %v4524_v3  ;;  %v4578_v2 = vcombine.high %v657_v53, %v661_v55  ;;  %v4580_v3 = vcombine.high %v658_v58, %v662_v59  ;;  %v697_v58 = vld [vmem:[%s5159_s30 + $0xe90] sm:$0xff] }
 0x22a   : > { %v701_v59 = vld [vmem:[%s5159_s30 + $0xeb0] sm:$0xff] }
 0x22c   : > { %3792 = vmatpush1.bf16.msra.mxu0 %v4521_v8  ;;  %3956 = vmatpush1.bf16.msra.mxu1 %v4523_v9  ;;  %v670_v8 = vld [vmem:[%s5159_s30 + $0xdb8] sm:$0xff] }
 0x22d   : > { %3793 = vmatprep.subr.bf16.mxu0 %v4530_v10  ;;  %3957 = vmatprep.subr.bf16.mxu1 %v4532_v11  ;;  %v4577_v11 = vcombine.low %v657_v53, %v661_v55 }
 0x230   : > { %3794 = vmatpush1.bf16.msra.mxu0 %v4529_v17  ;;  %3958 = vmatpush1.bf16.msra.mxu1 %v4531_v18  ;;  %v4588_v17 = vcombine.high %v666_v7, %v670_v8  ;;  %v673_v18 = vld [vmem:[%s5159_s30 + $0xdd0] sm:$0xff] }
 0x231   : > { %3804 = vmatprep.subr.bf16.mxu0 %v4538_v19  ;;  %3968 = vmatprep.subr.bf16.mxu1 %v4540_v57  ;;  %v677_v19 = vld [vmem:[%s5159_s30 + $0xdf0] sm:$0xff] }
 0x233   : > { %3796 = vmatmul.mubr.bf16.vlgmr.msra.gmra.mrb[4].mxu0 %v5387_v36  ;;  %3960 = vmatmul.mubr.bf16.vlgmr.msra.gmra.mrb[4].mxu1 %v5387_v36  ;;  %v753_v36 = vlaneseq }
 0x234   : > { %3805 = vmatpush1.bf16.msra.mxu0 %v4537_v12  ;;  %3969 = vmatpush1.bf16.msra.mxu1 %v4539_v26 }
 0x235   : > { %3806 = vmatprep.subr.bf16.mxu0 %v4546_v27  ;;  %3970 = vmatprep.subr.bf16.mxu1 %v4548_v28  ;;  %v5685_v49 = vshrl.u32 %v753_v36, 7  ;;  %v685_v36 = vld [vmem:[%s5159_s30 + $0xe30] sm:$0xff] }
 0x236   : > { %3836 = vmatprep.mubr.bf16.mxu0 %v5393_v46  ;;  %4000 = vmatprep.mubr.bf16.mxu1 %v5393_v46  ;;  %v4561_v46 = vcombine.low %v641_v37, %v645_v38  ;;  %v4602_v45 = vcombine.high %v681_v40, %v685_v36 }
 0x237   : > { %v755_v56 = vsub.s32 0, %v5685_v49  ;;  %v763_v62 = vsub.s32 2, %v5685_v49  ;;  %v759_v63 = vsub.s32 1, %v5685_v49  ;;  %v767_v1 = vsub.s32 3, %v5685_v49 }
 0x238   : > { %3807 = vmatpush1.bf16.msra.mxu0 %v4545_v34  ;;  %3971 = vmatpush1.bf16.msra.mxu1 %v4547_v22  ;;  %v4587_v22 = vcombine.low %v666_v7, %v670_v8  ;;  %v4617_v7 = vcombine.low %v697_v58, %v701_v59 }
 0x239   : > { %3808 = vmatprep.subr.bf16.mxu0 %v4554_v21  ;;  %3972 = vmatprep.subr.bf16.mxu1 %v4556_v35  ;;  %v756_v6 = vrot.slane %v5692_v61, %v755_v56  ;;  %v764_v9 = vrot.slane %v5692_v61, %v763_v62  ;;  %v760_v10 = vrot.slane %v5692_v61, %v759_v63  ;;  %v702_v62 = vld [vmem:[%s5159_s30 + $0xeb8] sm:$0xff] }
 0x23a   : > { %v768_v13 = vrot.slane %v5692_v61, %v767_v1  ;;  %v4594_v21 = vcombine.high %v673_v18, %v677_v19  ;;  %v4618_v1 = vcombine.high %v697_v58, %v701_v59 }
 0x23c   : > { %3809 = vmatpush1.bf16.msra.mxu0 %v4553_v41  ;;  %3973 = vmatpush1.bf16.msra.mxu1 %v4555_v42  ;;  %v682_v42 = vld [vmem:[%s5159_s30 + $0xe18] sm:$0xff] }
 0x23d   : > { %3810 = vmatprep.subr.bf16.mxu0 %v4562_v43  ;;  %3974 = vmatprep.subr.bf16.mxu1 %v4564_v32  ;;  %v686_v43 = vld [vmem:[%s5159_s30 + $0xe38] sm:$0xff]  ;;  %v4593_v32 = vcombine.low %v673_v18, %v677_v19 }
 0x23e   : > { %v4604_v47 = vcombine.high %v682_v42, %v686_v43  ;;  %v4603_v53 = vcombine.low %v682_v42, %v686_v43 }
 0x240   : > { %3811 = vmatpush1.bf16.msra.mxu0 %v4561_v46  ;;  %3975 = vmatpush1.bf16.msra.mxu1 %v4563_v50  ;;  %v693_v46 = vld [vmem:[%s5159_s30 + $0xe70] sm:$0xff]  ;;  %v690_v50 = vld [vmem:[%s5159_s30 + $0xe58] sm:$0xff] }
 0x241   : > { %3812 = vmatprep.subr.bf16.mxu0 %v4570_v51  ;;  %3976 = vmatprep.subr.bf16.mxu1 %v4572_v52  ;;  %v694_v51 = vld [vmem:[%s5159_s30 + $0xe78] sm:$0xff]  ;;  %v4601_v52 = vcombine.low %v681_v40, %v685_v36  ;;  %v4610_v55 = vcombine.high %v689_v48, %v693_v46  ;;  %v4609_v63 = vcombine.low %v689_v48, %v693_v46  ;;  %v783_v48 = vsub.s32 7, %v5685_v49 }
 0x242   : > { %v4612_v56 = vcombine.high %v690_v50, %v694_v51 }
 0x244   : > { %3813 = vmatpush1.bf16.msra.mxu0 %v4569_v60  ;;  %3977 = vmatpush1.bf16.msra.mxu1 %v4571_v0  ;;  %v698_v60 = vld [vmem:[%s5159_s30 + $0xe98] sm:$0xff]  ;;  %v4611_v0 = vcombine.low %v690_v50, %v694_v51 }
 0x245   : > { %3814 = vmatprep.subr.bf16.mxu0 %v4578_v2  ;;  %3978 = vmatprep.subr.bf16.mxu1 %v4580_v3  ;;  %v4620_v2 = vcombine.high %v698_v60, %v702_v62  ;;  %v705_v3 = vld [vmem:[%s5159_s30 + $0xed0] sm:$0xff]  ;;  %v4619_v8 = vcombine.low %v698_v60, %v702_v62 }
 0x246   : > { %v3510_v16 = vpop.f32.mrb[0].mxu0  ;;  %v3674_v20 = vpop.f32.mrb[0].mxu1 }
 0x247   : > { %v4669_v57 = vadd.f32 %v3510_v16, %v756_v6  ;;  %v3512_v23 = vpop.f32.mrb[1].mxu0  ;;  %v4671_v12 = vadd.f32 %v3674_v20, %v764_v9  ;;  %v3676_v27 = vpop.f32.mrb[1].mxu1  ;;  %v710_v6 = vld [vmem:[%s5159_s30 + $0xef8] sm:$0xff]  ;;  %v4626_v9 = vcombine.high %v705_v3, %v709_v4  ;;  %v4625_v16 = vcombine.low %v705_v3, %v709_v4  ;;  %v725_v20 = vld [vmem:[%s5159_s30 + $0xf70] sm:$0xff] }
 0x248   : > { %v4670_v26 = vadd.f32 %v3512_v23, %v760_v10  ;;  %v3514_v28 = vpop.f32.mrb[2].mxu0  ;;  %3815 = vmatpush1.bf16.msra.mxu0 %v4577_v11  ;;  %v4672_v31 = vadd.f32 %v3676_v27, %v768_v13  ;;  %v3678_v33 = vpop.f32.mrb[2].mxu1  ;;  %3979 = vmatpush1.bf16.msra.mxu1 %v4579_v14  ;;  %v4628_v10 = vcombine.high %v706_v5, %v710_v6  ;;  %v713_v11 = vld [vmem:[%s5159_s30 + $0xf10] sm:$0xff]  ;;  %v714_v14 = vld [vmem:[%s5159_s30 + $0xf18] sm:$0xff] }
 0x249   : > { %v4009_v30 = vmax.f32 %v4669_v57, 0.0  ;;  %v3515_v34 = vpop.f32.mrb[3].mxu0  ;;  %3816 = vmatprep.subr.bf16.mxu0 %v4586_v15  ;;  %v4011_v35 = vmax.f32 %v4671_v12, 0.0  ;;  %v3679_v38 = vpop.f32.mrb[3].mxu1  ;;  %3980 = vmatprep.subr.bf16.mxu1 %v4588_v17  ;;  %v717_v13 = vld [vmem:[%s5159_s30 + $0xf30] sm:$0xff]  ;;  %v718_v15 = vld [vmem:[%s5159_s30 + $0xf38] sm:$0xff]  ;;  %v4627_v17 = vcombine.low %v706_v5, %v710_v6 }
 0x24a   : > { %v4010_v37 = vmax.f32 %v4670_v26, 0.0  ;;  %v4012_v41 = vmax.f32 %v4672_v31, 0.0  ;;  %v4634_v18 = vcombine.high %v713_v11, %v717_v13  ;;  %v4636_v19 = vcombine.high %v714_v14, %v718_v15  ;;  %v721_v57 = vld [vmem:[%s5159_s30 + $0xf50] sm:$0xff]  ;;  %v722_v23 = vld [vmem:[%s5159_s30 + $0xf58] sm:$0xff] }
 0x24b   : > { %4017 = vst [vmem:[%s5714_s20] sm:$0xff] %v4009_v30  ;;  %4019 = vst [vmem:[%s5714_s20 + $0x10] sm:$0xff] %v4011_v35  ;;  %v4633_v25 = vcombine.low %v713_v11, %v717_v13  ;;  %v4635_v12 = vcombine.low %v714_v14, %v718_v15  ;;  %v4642_v26 = vcombine.high %v721_v57, %v725_v20  ;;  %v729_v28 = vld [vmem:[%s5159_s30 + $0xf90] sm:$0xff]  ;;  %v730_v30 = vld [vmem:[%s5159_s30 + $0xf98] sm:$0xff] }
 0x24c   : > { %4018 = vst [vmem:[%s5714_s20 + $0x8] sm:$0xff] %v4010_v37  ;;  %3817 = vmatpush1.bf16.msra.mxu0 %v4585_v29  ;;  %4020 = vst [vmem:[%s5714_s20 + $0x18] sm:$0xff] %v4012_v41  ;;  %3981 = vmatpush1.bf16.msra.mxu1 %v4587_v22  ;;  %v4644_v27 = vcombine.high %v722_v23, %v726_v24  ;;  %v733_v29 = vld [vmem:[%s5159_s30 + $0xfb0] sm:$0xff]  ;;  %v734_v31 = vld [vmem:[%s5159_s30 + $0xfb8] sm:$0xff]  ;;  %v4641_v33 = vcombine.low %v721_v57, %v725_v20 }
 0x24d   : > { %3818 = vmatprep.subr.bf16.mxu0 %v4594_v21  ;;  %3982 = vmatprep.subr.bf16.mxu1 %v4596_v39  ;;  %v4643_v34 = vcombine.low %v722_v23, %v726_v24  ;;  %v4650_v22 = vcombine.high %v729_v28, %v733_v29  ;;  %v4652_v21 = vcombine.high %v730_v30, %v734_v31  ;;  %v737_v35 = vld [vmem:[%s5159_s30 + $0xfd0] sm:$0xff]  ;;  %v738_v38 = vld [vmem:[%s5159_s30 + $0xfd8] sm:$0xff] }
 0x24e   : > { %v741_v37 = vld [vmem:[%s5159_s30 + $0xff0] sm:$0xff]  ;;  %v742_v39 = vld [vmem:[%s5159_s30 + $0xff8] sm:$0xff]  ;;  %v4649_v40 = vcombine.low %v729_v28, %v733_v29  ;;  %v4651_v36 = vcombine.low %v730_v30, %v734_v31 }
 0x24f   : > { %v4658_v41 = vcombine.high %v737_v35, %v741_v37  ;;  %v4660_v42 = vcombine.high %v738_v38, %v742_v39  ;;  %v4657_v43 = vcombine.low %v737_v35, %v741_v37 }
 0x250   : > { %3819 = vmatpush1.bf16.msra.mxu0 %v4593_v32  ;;  %3983 = vmatpush1.bf16.msra.mxu1 %v4595_v44  ;;  %v4659_v32 = vcombine.low %v738_v38, %v742_v39  ;;  %v771_v44 = vsub.s32 4, %v5685_v49 }
 0x251   : > { %3820 = vmatprep.subr.bf16.mxu0 %v4602_v45  ;;  %3984 = vmatprep.subr.bf16.mxu1 %v4604_v47  ;;  %v779_v45 = vsub.s32 6, %v5685_v49  ;;  %v775_v47 = vsub.s32 5, %v5685_v49 }
 0x252   : > { %v772_v46 = vrot.slane %v5692_v61, %v771_v44 }
 0x253   : > { %v780_v50 = vrot.slane %v5692_v61, %v779_v45  ;;  %v776_v51 = vrot.slane %v5692_v61, %v775_v47 }
 0x254   : > { %3821 = vmatpush1.bf16.msra.mxu0 %v4601_v52  ;;  %3985 = vmatpush1.bf16.msra.mxu1 %v4603_v53  ;;  %v784_v52 = vrot.slane %v5692_v61, %v783_v48 }
 0x255   : > { %3822 = vmatprep.subr.bf16.mxu0 %v4610_v55  ;;  %3986 = vmatprep.subr.bf16.mxu1 %v4612_v56 }
 0x258   : > { %3823 = vmatpush1.bf16.msra.mxu0 %v4609_v63  ;;  %3987 = vmatpush1.bf16.msra.mxu1 %v4611_v0 }
 0x259   : > { %3824 = vmatprep.subr.bf16.mxu0 %v4618_v1  ;;  %3988 = vmatprep.subr.bf16.mxu1 %v4620_v2 }
 0x25c   : > { %3825 = vmatpush1.bf16.msra.mxu0 %v4617_v7  ;;  %3989 = vmatpush1.bf16.msra.mxu1 %v4619_v8 }
 0x25d   : > { %3826 = vmatprep.subr.bf16.mxu0 %v4626_v9  ;;  %3990 = vmatprep.subr.bf16.mxu1 %v4628_v10 }
 0x260   : > { %3827 = vmatpush1.bf16.msra.mxu0 %v4625_v16  ;;  %3991 = vmatpush1.bf16.msra.mxu1 %v4627_v17 }
 0x261   : > { %3828 = vmatprep.subr.bf16.mxu0 %v4634_v18  ;;  %3992 = vmatprep.subr.bf16.mxu1 %v4636_v19 }
 0x264   : > { %3829 = vmatpush1.bf16.msra.mxu0 %v4633_v25  ;;  %3993 = vmatpush1.bf16.msra.mxu1 %v4635_v12 }
 0x265   : > { %3830 = vmatprep.subr.bf16.mxu0 %v4642_v26  ;;  %3994 = vmatprep.subr.bf16.mxu1 %v4644_v27 }
 0x268   : > { %3831 = vmatpush1.bf16.msra.mxu0 %v4641_v33  ;;  %3995 = vmatpush1.bf16.msra.mxu1 %v4643_v34 }
 0x269   : > { %3832 = vmatprep.subr.bf16.mxu0 %v4650_v22  ;;  %3996 = vmatprep.subr.bf16.mxu1 %v4652_v21 }
 0x26c   : > { %3833 = vmatpush1.bf16.msra.mxu0 %v4649_v40  ;;  %3997 = vmatpush1.bf16.msra.mxu1 %v4651_v36 }
 0x26d   : > { %3834 = vmatprep.subr.bf16.mxu0 %v4658_v41  ;;  %3998 = vmatprep.subr.bf16.mxu1 %v4660_v42 }
 0x270   : > { %3835 = vmatpush1.bf16.msra.mxu0 %v4657_v43  ;;  %3999 = vmatpush1.bf16.msra.mxu1 %v4659_v32 }
 0x273   : > { %3837 = vmatmul.mubr.bf16.vlgmr.msra.gmra.mrb[4].mxu0 %v5459_v54  ;;  %4001 = vmatmul.mubr.bf16.vlgmr.msra.gmra.mrb[4].mxu1 %v5459_v54 }
 0x346   : > { %v3838_v53 = vpop.f32.mrb[4].mxu0  ;;  %v4002_v55 = vpop.f32.mrb[4].mxu1 }
 0x347   : > { %v4673_v54 = vadd.f32 %v3838_v53, %v772_v46  ;;  %v3840_v56 = vpop.f32.mrb[5].mxu0  ;;  %v4675_v58 = vadd.f32 %v4002_v55, %v780_v50  ;;  %v4004_v60 = vpop.f32.mrb[5].mxu1 }
 0x348   : > { %v4674_v59 = vadd.f32 %v3840_v56, %v776_v51  ;;  %v3842_v62 = vpop.f32.mrb[6].mxu0  ;;  %v4676_v63 = vadd.f32 %v4004_v60, %v784_v52  ;;  %v4006_v0 = vpop.f32.mrb[6].mxu1 }
 0x349   : > { %v4013_v49 = vmax.f32 %v4673_v54, 0.0  ;;  %v3843_v61 = vpop.f32.mrb[7].mxu0  ;;  %v4015_v1 = vmax.f32 %v4675_v58, 0.0  ;;  %v4007_v3 = vpop.f32.mrb[7].mxu1 }
 0x34a   : > { %v4014_v2 = vmax.f32 %v4674_v59, 0.0  ;;  %v4016_v4 = vmax.f32 %v4676_v63, 0.0 }
 0x34b   : > { %4021 = vst [vmem:[%s5714_s20 + $0x20] sm:$0xff] %v4013_v49  ;;  %4023 = vst [vmem:[%s5714_s20 + $0x30] sm:$0xff] %v4015_v1 }
 0x34c   : > { %4022 = vst [vmem:[%s5714_s20 + $0x28] sm:$0xff] %v4014_v2  ;;  %4024 = vst [vmem:[%s5714_s20 + $0x38] sm:$0xff] %v4016_v4 }
 0x34d   : > { %4893 = shalt.err (!%p4890_p13)
}
 0x34e   : > { %s4894_s5 = scalar_lea.hbm %s5766_s7, 1024  ;;  %s4898_s26 = scalar_lea.hbm %s5815_s3, 4096 }
 0x34f   : > { %p4895_p4 = scmp.ne.s32.totalorder %s5766_s7, %s4894_s5  ;;  %p4899_p8 = scmp.lt.u32.totalorder %s5766_s7, %s5815_s3 }
 0x350   : > { %p4900_p7 = scmp.lt.u32.totalorder %s4898_s26, %s4894_s5  ;;  %p4902_p9 = scmp.lt.u32.totalorder %s4894_s5, %s5766_s7 }
 0x351   : > { %p4896_p11 = pnand %p4895_p4, %p5835_p10 }
 0x352   : > { %p4901_p5 = por %p4900_p7, %p4899_p8 }
 0x353   : > { %p4897_p3 = pneg %p4896_p11 }
 0x354   : > { %p4903_p1 = por %p4902_p9, %p4901_p5 }
 0x356   : > { %p4904_p2 = pnand %p4903_p1, %p4897_p3 }
 0x358   : > { %4907 = shalt.err (!%p4904_p2)
}
 0x359   : > { %4735 = dma.vmem_to_hbm [thread:$0]  (%p5835_p10), %s5768_s22, 1024, %s5766_s7, %s4026_s16  }
 0x35a PF: > { %p4757_p0 = scmp.ge.s32.totalorder %s4954_s15, 2  ;;  %s4052_s10 = sand.u32 1, %s4942_s12  }
 0x35b   : > { %p5836_p6 = scmp.ne.s32.totalorder %s5824_s25, 0  ;;  %s4053_s19 = scalar_lea.sflag [#allocation4], %s4052_s10 }
 0x35d   : > { %p4749_p12 = pnand %p4757_p0, %p5836_p6 }
 0x35f   : > { %4937 = dma.done.wait (!%p4749_p12), %s4053_s19, 1024  }
 0x360   : > { %4939 = vsyncadd (!%p4749_p12), %s4053_s19, 4294966272  ;;  %p17_p13 = scmp.ge.s32.totalorder %s5007_s18, 6   ;;  %s5837_s12 = smov %s4946_s13 }
 0x361   : > { %s5838_s13 = smov %s4950_s14  ;;  %s5839_s14 = smov %s5019_s21 }
 0x362   : > { %s5840_s15 = smov %s5007_s18  ;;  %19 = sbr.rel (!%p17_p13) target bundleno = 6 (0x6), region = 87 }
 0x369   :  { %4058 = vsyncpa [#allocation3], 1 }
 0x36a   :  { %4060 = vsyncpa [#allocation3 + $0x1], 1 }
 0x36b   :  { %4061 = vsyncpa [#allocation6], 1 }
 0x36c   :  { %4063 = vsyncpa [#allocation6 + $0x1], 1 }
 0x36d   :  { %4064 = vsyncpa [#allocation4], 1 }
 0x36e   :  { %4066 = vsyncpa [#allocation4 + $0x1], 1 }

</bundles_post_ra>
